<compile_context>
chip_gen: v6e
topology: v6e:2x2x1
jax: 0.10.0
libtpu: 0.0.40
codegen_flags: <defaults>
</compile_context>

<pallas_src>
import functools

import jax
import jax.numpy as jnp
from jax.experimental import pallas as pl
from jax.experimental.pallas import tpu as pltpu

BN_EPS = 1e-5          # nn.BatchNorm default eps
LRELU_SLOPE = 0.2      # nn.LeakyReLU(negative_slope=0.2)
STRIDE = 2             # every ConvTranspose2d in the generator uses stride 2

TM_MAX = 512           # row-tile cap (rows = output pixels of one phase)
TN_MAX = 512           # output-channel tile cap (NEW: N grid axis)
TK_MAX = 512           # K-tile cap  (K = taps * in_channels)
W_RESIDENT_BYTES = 8 * 1024 * 1024   # max bf16 bytes for a VMEM-resident weight block


def _tpu_vmem_capacity():
    try:
        return int(pltpu.get_tpu_info().vmem_capacity_bytes)
    except Exception:                              # pragma: no cover
        return 64 * 1024 * 1024                    # conservative (v7x per-core)


_VMEM_CAP = _tpu_vmem_capacity()
VMEM_LIMIT = int(_VMEM_CAP * 3 // 4)               # generation-aware scoped limit
DEEP_BUFFER = _VMEM_CAP >= 100 * 1024 * 1024       # v5e/v6e (128 MiB): deeper pipelining


def _rup(x, m):
    return (x + m - 1) // m * m


def _k_geometry(K):
    """(Kp, tk): K padded/tiled; multiples of 256 where cheap (v6e/v7x MXU)."""
    mult = 256 if K >= 256 else 128
    tk = min(TK_MAX, _rup(K, mult))
    Kp = _rup(K, tk)
    return Kp, tk


def _n_geometry(N):
    """(Np, tn): lane padding; multiples of 256 where cheap, tn divides Np."""
    mult = 256 if N >= 256 else 128
    Np = _rup(N, mult)
    if Np > TN_MAX:
        Np = _rup(N, TN_MAX)
    tn = min(TN_MAX, Np)
    return Np, tn


def _bspec(shape, index_map, deep=False):
    """BlockSpec with optional 3-deep buffering (v5e/v6e only, guarded)."""
    if deep:
        try:
            return pl.BlockSpec(shape, index_map, pipeline_mode=pl.Buffered(3))
        except Exception:                          # older jax: fall back silently
            pass
    return pl.BlockSpec(shape, index_map)


def _vmem_spec():
    return pl.BlockSpec(memory_space=pltpu.MemorySpace.VMEM)


# ---------------------------------------------------------------------------
# Pallas kernels
# ---------------------------------------------------------------------------
def _mm_stats_kernel(x_ref, w_ref, y_ref, st_ref, acc_ref, *, tk, resident_w):
    """Tiled matmul (bf16 in, small f32 VMEM accumulator) emitting bf16 y plus
    per-tile column sums / sums-of-squares for the streaming BatchNorm."""
    kk = pl.program_id(3)

    @pl.when(kk == 0)
    def _():
        acc_ref[...] = jnp.zeros_like(acc_ref)

    if resident_w:
        # whole per-phase weight stays VMEM-resident; slice the K chunk here
        w = w_ref[pl.ds(pl.multiple_of(kk * tk, tk), tk), :]
    else:
        w = w_ref[...]
    acc_ref[...] += jnp.dot(x_ref[0], w, preferred_element_type=jnp.float32)

    @pl.when(kk == pl.num_programs(3) - 1)
    def _():
        y = acc_ref[...]
        y_ref[...] = y.astype(y_ref.dtype)[None]          # bf16 writeback
        s = jnp.sum(y, axis=0, keepdims=True)             # (1, tn)
        sq = jnp.sum(y * y, axis=0, keepdims=True)        # (1, tn)
        rows = jax.lax.broadcasted_iota(jnp.int32, (8, y.shape[1]), 0)
        stats = jnp.where(rows == 0, s, jnp.where(rows == 1, sq, 0.0))
        st_ref[...] = stats[None, None]                   # (1, 1, 8, tn)


def _finalize_bn_kernel(st_ref, gamma_ref, beta_ref, scale_ref, shift_ref, *,
                        inv_count):
    """Reduce per-tile partial sums into per-channel BN scale / shift."""
    tot = jnp.sum(st_ref[...], axis=(0, 1))               # (8, Np)
    mean = tot[0:1, :] * inv_count                        # (1, Np)
    var = jnp.maximum(tot[1:2, :] * inv_count - mean * mean, 0.0)
    scale = gamma_ref[...] * jax.lax.rsqrt(var + BN_EPS)
    scale_ref[...] = scale
    shift_ref[...] = beta_ref[...] - mean * scale


def _bn_lrelu_kernel(y_ref, scale_ref, shift_ref, o_ref):
    """Lane-dense apply pass: y*scale + shift then LeakyReLU(0.2), f32 math."""
    y = y_ref[0].astype(jnp.float32) * scale_ref[...] + shift_ref[...]
    y = jnp.where(y >= 0, y, LRELU_SLOPE * y)
    o_ref[...] = y.astype(o_ref.dtype)[None]


def _mm_tanh_kernel(x_ref, w_ref, o_ref, acc_ref, *, tk, resident_w):
    """Tiled matmul + fused tanh (final ConvTranspose2d, no BN), bf16 out."""
    kk = pl.program_id(3)

    @pl.when(kk == 0)
    def _():
        acc_ref[...] = jnp.zeros_like(acc_ref)

    if resident_w:
        w = w_ref[pl.ds(pl.multiple_of(kk * tk, tk), tk), :]
    else:
        w = w_ref[...]
    acc_ref[...] += jnp.dot(x_ref[0], w, preferred_element_type=jnp.float32)

    @pl.when(kk == pl.num_programs(3) - 1)
    def _():
        o_ref[...] = jnp.tanh(acc_ref[...]).astype(o_ref.dtype)[None]


# ---------------------------------------------------------------------------
# Pallas-call wrappers (tiling / padding glue)
# ---------------------------------------------------------------------------
def _pad_cast_lhs(x3, Mp, Kp):
    P, M, K = x3.shape
    if (M, K) != (Mp, Kp):
        x3 = jnp.pad(x3, ((0, 0), (0, Mp - M), (0, Kp - K)))
    return x3.astype(jnp.bfloat16)


def _mm_geometry(x3, w3p):
    P, M, K = x3.shape
    Pw, Kp, Np = w3p.shape
    Kp_want, tk = _k_geometry(K)
    assert Pw == P and Kp == Kp_want and Np % 128 == 0
    tm = min(TM_MAX, _rup(M, 8))
    Mp = _rup(M, tm)
    tn = min(TN_MAX, Np)
    assert Np % tn == 0
    Mt, Nt, Kt = Mp // tm, Np // tn, Kp // tk
    resident_w = Kp * tn * 2 <= W_RESIDENT_BYTES     # bf16 bytes per buffer
    return P, Mp, Kp, Np, tm, tk, tn, Mt, Nt, Kt, resident_w


def _weight_spec(Kp, tk, tn, resident_w):
    if resident_w:
        # resident across M/K tiles: index map ignores i and kk (grid order P,N,M,K)
        return pl.BlockSpec((None, Kp, tn), lambda ph, j, i, kk: (ph, 0, j))
    return pl.BlockSpec((None, tk, tn), lambda ph, j, i, kk: (ph, kk, j))


def matmul_bn_lrelu(x3, w3p, gamma_p, beta_p, m_count):
    """leaky_relu(batchnorm(x @ w)) with BN stats over all rows of all phases.

    x3: (P, M, K) activations; w3p: (P, Kp, Np) pre-padded bf16 weights;
    gamma_p / beta_p: (1, Np) f32.  Returns bf16 (P, Mp, Np)."""
    P, Mp, Kp, Np, tm, tk, tn, Mt, Nt, Kt, resident_w = _mm_geometry(x3, w3p)
    assert gamma_p.shape == (1, Np) and beta_p.shape == (1, Np)
    x3p = _pad_cast_lhs(x3, Mp, Kp)

    deep1 = DEEP_BUFFER and (P * Nt * Mt * Kt) >= 8
    mm_cost = pl.CostEstimate(
        flops=2 * P * Mp * Kp * Np, transcendentals=0,
        bytes_accessed=x3p.size * 2 * Nt + w3p.size * 2 + P * Mp * Np * 2)

    # pass 1: tiled matmul + per-tile column sums / sumsq, grid (P, N, M, K)
    y, stats = pl.pallas_call(
        functools.partial(_mm_stats_kernel, tk=tk, resident_w=resident_w),
        grid=(P, Nt, Mt, Kt),
        in_specs=[
            _bspec((1, tm, tk), lambda ph, j, i, kk: (ph, i, kk), deep=deep1),
            _weight_spec(Kp, tk, tn, resident_w),
        ],
        out_specs=(
            pl.BlockSpec((1, tm, tn), lambda ph, j, i, kk: (ph, i, j)),
            pl.BlockSpec((1, 1, 8, tn), lambda ph, j, i, kk: (ph, i, 0, j)),
        ),
        out_shape=(
            jax.ShapeDtypeStruct((P, Mp, Np), jnp.bfloat16),
            jax.ShapeDtypeStruct((P, Mt, 8, Np), jnp.float32),
        ),
        scratch_shapes=[pltpu.VMEM((tm, tn), jnp.float32)],
        compiler_params=pltpu.CompilerParams(
            dimension_semantics=("parallel", "parallel", "parallel", "arbitrary"),
            vmem_limit_bytes=VMEM_LIMIT),
        cost_estimate=mm_cost,
    )(x3p, w3p)

    # pass 2: finalize BN statistics into per-channel scale / shift
    scale, shift = pl.pallas_call(
        functools.partial(_finalize_bn_kernel, inv_count=1.0 / float(m_count)),
        in_specs=[_vmem_spec(), _vmem_spec(), _vmem_spec()],
        out_specs=(_vmem_spec(), _vmem_spec()),
        out_shape=(jax.ShapeDtypeStruct((1, Np), jnp.float32),
                   jax.ShapeDtypeStruct((1, Np), jnp.float32)),
        compiler_params=pltpu.CompilerParams(vmem_limit_bytes=VMEM_LIMIT),
    )(stats, gamma_p, beta_p)

    # pass 3: lane-dense tiled apply (normalize + LeakyReLU), bf16 in / bf16 out
    deep3 = DEEP_BUFFER and (P * Mt * Nt) >= 8
    out = pl.pallas_call(
        _bn_lrelu_kernel,
        grid=(P, Mt, Nt),
        in_specs=[
            _bspec((1, tm, tn), lambda ph, i, j: (ph, i, j), deep=deep3),
            pl.BlockSpec((1, tn), lambda ph, i, j: (0, j)),
            pl.BlockSpec((1, tn), lambda ph, i, j: (0, j)),
        ],
        out_specs=pl.BlockSpec((1, tm, tn), lambda ph, i, j: (ph, i, j)),
        out_shape=jax.ShapeDtypeStruct((P, Mp, Np), jnp.bfloat16),
        compiler_params=pltpu.CompilerParams(
            dimension_semantics=("parallel", "parallel", "parallel"),
            vmem_limit_bytes=VMEM_LIMIT),
    )(y, scale, shift)
    return out


def matmul_tanh(x3, w3p):
    """tanh(x @ w) for the final ConvTranspose2d.  Returns bf16 (P, Mp, Np)."""
    P, Mp, Kp, Np, tm, tk, tn, Mt, Nt, Kt, resident_w = _mm_geometry(x3, w3p)
    x3p = _pad_cast_lhs(x3, Mp, Kp)

    deep1 = DEEP_BUFFER and (P * Nt * Mt * Kt) >= 8
    cost = pl.CostEstimate(
        flops=2 * P * Mp * Kp * Np, transcendentals=P * Mp * Np,
        bytes_accessed=x3p.size * 2 * Nt + w3p.size * 2 + P * Mp * Np * 2)

    return pl.pallas_call(
        functools.partial(_mm_tanh_kernel, tk=tk, resident_w=resident_w),
        grid=(P, Nt, Mt, Kt),
        in_specs=[
            _bspec((1, tm, tk), lambda ph, j, i, kk: (ph, i, kk), deep=deep1),
            _weight_spec(Kp, tk, tn, resident_w),
        ],
        out_specs=pl.BlockSpec((1, tm, tn), lambda ph, j, i, kk: (ph, i, j)),
        out_shape=jax.ShapeDtypeStruct((P, Mp, Np), jnp.bfloat16),
        scratch_shapes=[pltpu.VMEM((tm, tn), jnp.float32)],
        compiler_params=pltpu.CompilerParams(
            dimension_semantics=("parallel", "parallel", "parallel", "arbitrary"),
            vmem_limit_bytes=VMEM_LIMIT),
        cost_estimate=cost,
    )(x3p, w3p)


# ---------------------------------------------------------------------------
# ConvTranspose2d sub-pixel (stride-phase) decomposition — layout glue in XLA
# ---------------------------------------------------------------------------
def _phase_axis_params(k, pad):
    """Per output-parity: (first kernel tap parity, #taps, base input offset)."""
    out = []
    for ph in range(STRIDE):
        pk = (ph + pad) % STRIDE
        taps = (k - pk + STRIDE - 1) // STRIDE
        base = (ph + pad - pk) // STRIDE
        out.append((pk, taps, base))
    return out


def convt_phase_patches(x_nhwc, k, pad, out_pad):
    """Returns patches (4, N*Ho/2*Wo/2, Tmax^2*Ci) over the *undilated* input
    plus output geometry.  Phase (py, px) holds output pixels (2i+py, 2j+px).
    The input is padded ONCE with the max halo shared by all phases."""
    N, Hi, Wi, Ci = x_nhwc.shape
    Ho = (Hi - 1) * STRIDE - 2 * pad + k + out_pad
    Wo = (Wi - 1) * STRIDE - 2 * pad + k + out_pad
    assert Ho % STRIDE == 0 and Wo % STRIDE == 0
    Hop, Wop = Ho // STRIDE, Wo // STRIDE
    Tmax = (k + STRIDE - 1) // STRIDE
    axis_par = _phase_axis_params(k, pad)
    top = max(max(0, (t - 1) - a) for _, t, a in axis_par)
    left = max(max(0, (t - 1) - a) for _, t, a in axis_par)
    bot = max(max(0, (Hop - 1 + a) - (Hi - 1)) for _, t, a in axis_par)
    right = max(max(0, (Wop - 1 + a) - (Wi - 1)) for _, t, a in axis_par)
    xp = jnp.pad(x_nhwc, ((0, 0), (top, bot), (left, right), (0, 0)))
    phases = []
    for py in range(STRIDE):
        _, ty_n, ay = axis_par[py]
        for px in range(STRIDE):
            _, tx_n, ax = axis_par[px]
            taps = []
            for ty in range(ty_n):
                r0 = ay - ty + top
                for tx in range(tx_n):
                    c0 = ax - tx + left
                    taps.append(xp[:, r0:r0 + Hop, c0:c0 + Wop, :])
            pat = jnp.stack(taps, axis=3).reshape(N * Hop * Wop, ty_n * tx_n * Ci)
            if ty_n * tx_n < Tmax * Tmax:
                pat = jnp.pad(pat, ((0, 0), (0, (Tmax * Tmax - ty_n * tx_n) * Ci)))
            phases.append(pat)
    return jnp.stack(phases, axis=0), (N, Ho, Wo)


def _interleave_phases(yp, N, Ho, Wo, Co):
    """(4, N*Ho/2*Wo/2, Co), phase order (py, px) -> (N, Ho, Wo, Co)."""
    # TODO(synk): fold this transpose into the next layer's tap extraction.
    Hop, Wop = Ho // STRIDE, Wo // STRIDE
    y = yp.reshape(STRIDE, STRIDE, N, Hop, Wop, Co)
    y = jnp.transpose(y, (2, 3, 0, 4, 1, 5))
    return y.reshape(N, Ho, Wo, Co)


# ---------------------------------------------------------------------------
# Hoisted parameter preprocessing (done once in init, not per forward call)
# ---------------------------------------------------------------------------
def _prep_matmul_weight(w3):
    """(P, K, N) f32 -> K/lane-padded bf16 (P, Kp, Np)."""
    P, K, N = w3.shape
    Kp, _ = _k_geometry(K)
    Np, _ = _n_geometry(N)
    if (K, N) != (Kp, Np):
        w3 = jnp.pad(w3, ((0, 0), (0, Kp - K), (0, Np - N)))
    return w3.astype(jnp.bfloat16)


def _prep_affine(v, pad_val):
    N = v.shape[0]
    Np, _ = _n_geometry(N)
    v = v.astype(jnp.float32)
    if Np != N:
        v = jnp.pad(v, (0, Np - N), constant_values=pad_val)
    return v.reshape(1, Np)


def _convt_phase_weights(w_pt, pad):
    """PyTorch ConvTranspose2d weight (Ci, Co, k, k) -> per-phase matmul
    weights (4, Kp, Np) in bf16 (taps padded to Tmax^2, lanes to 128/256)."""
    Ci, Co, k, _ = w_pt.shape
    Tmax = (k + STRIDE - 1) // STRIDE
    axis_par = _phase_axis_params(k, pad)
    mats = []
    for py in range(STRIDE):
        pk_y, ty_n, _ = axis_par[py]
        for px in range(STRIDE):
            pk_x, tx_n, _ = axis_par[px]
            sub = w_pt[:, :, pk_y::STRIDE, pk_x::STRIDE]           # (Ci,Co,ty,tx)
            sub = jnp.transpose(sub, (2, 3, 0, 1)).reshape(ty_n * tx_n * Ci, Co)
            if ty_n * tx_n < Tmax * Tmax:
                sub = jnp.pad(sub, ((0, (Tmax * Tmax - ty_n * tx_n) * Ci), (0, 0)))
            mats.append(sub)
    return _prep_matmul_weight(jnp.stack(mats, axis=0))


# ---------------------------------------------------------------------------
# GeneratorDCGAN forward
# ---------------------------------------------------------------------------
def generator_forward(params, z, arch):
    min_map, gif, dense_out, blocks_arch, out_ch = arch
    B = z.shape[0]

    # dense (no bias) + BatchNorm1d + LeakyReLU(0.2)
    h = matmul_bn_lrelu(z[None], params["dense_w"], params["dense_gamma"],
                        params["dense_beta"], m_count=B)
    h = h[0, :B, :dense_out]
    # x.view(B, gif, m, m) (NCHW) -> NHWC for the conv kernels
    x = h.reshape(B, gif, min_map, min_map).transpose(0, 2, 3, 1)

    # ConvTransposeBlocks: convT(stride 2, no bias) + BatchNorm2d + LeakyReLU
    for blk_p, (k, pad, out_pad, cout) in zip(params["blocks"], blocks_arch):
        patches, (n, Ho, Wo) = convt_phase_patches(x, k, pad, out_pad)
        y = matmul_bn_lrelu(patches, blk_p["w"], blk_p["gamma"], blk_p["beta"],
                            m_count=patches.shape[0] * patches.shape[1])
        y = y[:, :patches.shape[1], :cout]
        x = _interleave_phases(y, n, Ho, Wo, cout)

    # last ConvTranspose2d (k=5, s=2, p=2, op=1, no bias) + Tanh, bf16 store
    patches, (n, Ho, Wo) = convt_phase_patches(x, 5, 2, 1)
    y = matmul_tanh(patches, params["last_w"])
    y = y[:, :patches.shape[1], :out_ch]
    out = _interleave_phases(y, n, Ho, Wo, out_ch)
    return jnp.transpose(out, (0, 3, 1, 2)).astype(jnp.float32)   # NCHW f32


# ---------------------------------------------------------------------------
# Deterministic parameter init (shapes follow GeneratorDCGAN.__init__)
# ---------------------------------------------------------------------------
def init_params(key, cfg):
    conv_number = cfg["g_resize_steps"]
    min_map = int(cfg["image_size"] // (2 ** conv_number))
    gif = cfg["g_initial_filters"]
    dense_out = min_map * min_map * gif

    keys = iter(jax.random.split(key, 4 * conv_number + 8))

    params = {
        "dense_w": _prep_matmul_weight(
            0.05 * jax.random.normal(next(keys), (1, cfg["zdim"], dense_out),
                                     jnp.float32)),
        "dense_gamma": _prep_affine(
            1.0 + 0.1 * jax.random.normal(next(keys), (dense_out,), jnp.float32), 1.0),
        "dense_beta": _prep_affine(
            0.1 * jax.random.normal(next(keys), (dense_out,), jnp.float32), 0.0),
        "blocks": [],
    }

    blocks_arch = []
    in_ch = gif
    out_ch = in_ch // 2
    for i in range(conv_number - 1):
        k, pad, out_pad = (4, 1, 0) if i == 0 else (5, 2, 1)
        w_pt = 0.05 * jax.random.normal(next(keys), (in_ch, out_ch, k, k), jnp.float32)
        params["blocks"].append({
            "w": _convt_phase_weights(w_pt, pad),
            "gamma": _prep_affine(
                1.0 + 0.1 * jax.random.normal(next(keys), (out_ch,), jnp.float32), 1.0),
            "beta": _prep_affine(
                0.1 * jax.random.normal(next(keys), (out_ch,), jnp.float32), 0.0),
        })
        blocks_arch.append((k, pad, out_pad, out_ch))
        in_ch = out_ch
        out_ch //= 2

    w_last = 0.05 * jax.random.normal(
        next(keys), (in_ch, cfg["input_channels"], 5, 5), jnp.float32)
    params["last_w"] = _convt_phase_weights(w_last, 2)

    arch = (min_map, gif, dense_out, tuple(blocks_arch), cfg["input_channels"])
    return params, arch


if __name__ == "__main__":
    # small config: image 16x16, 3 upsampling steps -> min map 2x2
    cfg = dict(image_size=16, g_resize_steps=3, g_initial_filters=16,
               zdim=8, input_channels=3)
    key = jax.random.PRNGKey(0)
    pkey, zkey = jax.random.split(key)
    params, arch = init_params(pkey, cfg)

    batch = 2
    z = jax.random.normal(zkey, (batch, cfg["zdim"]), jnp.float32)

    fwd = jax.jit(generator_forward, static_argnums=2)
    out = jax.block_until_ready(fwd(params, z, arch))
    assert out.shape == (batch, cfg["input_channels"],
                         cfg["image_size"], cfg["image_size"])
    assert bool(jnp.all(jnp.isfinite(out)))
    print("KERNEL_OK")
</pallas_src>

<mosaic_0001>
module attributes {stable_mosaic.version = 11 : i64} {
  func.func @_finalize_bn_kernel(%arg0: memref<1x1x8x128xf32, #tpu.memory_space<vmem>>, %arg1: memref<1x128xf32, #tpu.memory_space<vmem>>, %arg2: memref<1x128xf32, #tpu.memory_space<vmem>>, %arg3: memref<1x128xf32, #tpu.memory_space<vmem>>, %arg4: memref<1x128xf32, #tpu.memory_space<vmem>>) attributes {dimension_semantics = [], scalar_prefetch = 0 : i64, scratch_operands = 0 : i64, tpu.core_type = #tpu.core_type<tc>} {
    %c0 = arith.constant 0 : index
    %c0_0 = arith.constant 0 : index
    %c0_1 = arith.constant 0 : index
    %c0_2 = arith.constant 0 : index
    %0 = vector.load %arg0[%c0, %c0_0, %c0_1, %c0_2] : memref<1x1x8x128xf32, #tpu.memory_space<vmem>>, vector<1x1x8x128xf32>
    %cst = arith.constant dense<0.000000e+00> : vector<8x128xf32>
    %1 = vector.multi_reduction <add>, %0, %cst [0, 1] : vector<1x1x8x128xf32> to vector<8x128xf32>
    %2 = vector.extract_strided_slice %1 {offsets = [0, 0], sizes = [1, 128], strides = [1, 1]} : vector<8x128xf32> to vector<1x128xf32>
    %cst_3 = arith.constant 5.000000e-01 : f32
    %3 = vector.broadcast %cst_3 : f32 to vector<1x128xf32>
    %4 = arith.mulf %2, %3 : vector<1x128xf32>
    %5 = vector.extract_strided_slice %1 {offsets = [1, 0], sizes = [1, 128], strides = [1, 1]} : vector<8x128xf32> to vector<1x128xf32>
    %cst_4 = arith.constant 5.000000e-01 : f32
    %6 = vector.broadcast %cst_4 : f32 to vector<1x128xf32>
    %7 = arith.mulf %5, %6 : vector<1x128xf32>
    %8 = arith.mulf %4, %4 : vector<1x128xf32>
    %9 = arith.subf %7, %8 : vector<1x128xf32>
    %cst_5 = arith.constant 0.000000e+00 : f32
    %10 = vector.broadcast %cst_5 : f32 to vector<1x128xf32>
    %11 = arith.maximumf %9, %10 : vector<1x128xf32>
    %c0_6 = arith.constant 0 : index
    %c0_7 = arith.constant 0 : index
    %12 = vector.load %arg1[%c0_6, %c0_7] : memref<1x128xf32, #tpu.memory_space<vmem>>, vector<1x128xf32>
    %cst_8 = arith.constant 9.99999974E-6 : f32
    %13 = vector.broadcast %cst_8 : f32 to vector<1x128xf32>
    %14 = arith.addf %11, %13 : vector<1x128xf32>
    %15 = math.rsqrt %14 : vector<1x128xf32>
    %16 = arith.mulf %12, %15 : vector<1x128xf32>
    %c0_9 = arith.constant 0 : index
    %c0_10 = arith.constant 0 : index
    %17 = vector.load %arg3[%c0_9, %c0_10] : memref<1x128xf32, #tpu.memory_space<vmem>>, vector<1x128xf32>
    tpu.vector_store %arg3[%c0_9, %c0_10], %16 {strides = array<i32>} : memref<1x128xf32, #tpu.memory_space<vmem>>, vector<1x128xf32>,
    %c0_11 = arith.constant 0 : index
    %c0_12 = arith.constant 0 : index
    %18 = vector.load %arg2[%c0_11, %c0_12] : memref<1x128xf32, #tpu.memory_space<vmem>>, vector<1x128xf32>
    %19 = arith.mulf %4, %16 : vector<1x128xf32>
    %20 = arith.subf %18, %19 : vector<1x128xf32>
    %c0_13 = arith.constant 0 : index
    %c0_14 = arith.constant 0 : index
    %21 = vector.load %arg4[%c0_13, %c0_14] : memref<1x128xf32, #tpu.memory_space<vmem>>, vector<1x128xf32>
    tpu.vector_store %arg4[%c0_13, %c0_14], %20 {strides = array<i32>} : memref<1x128xf32, #tpu.memory_space<vmem>>, vector<1x128xf32>,
    return
  }
}

module attributes {stable_mosaic.version = 11 : i64} {
  func.func @_mm_stats_kernel(%arg0: i32, %arg1: i32, %arg2: i32, %arg3: i32, %arg4: memref<1x8x128xbf16, #tpu.memory_space<vmem>>, %arg5: memref<1x128x128xbf16, #tpu.memory_space<vmem>>, %arg6: memref<1x8x128xbf16, #tpu.memory_space<vmem>>, %arg7: memref<1x1x8x128xf32, #tpu.memory_space<vmem>>, %arg8: memref<8x128xf32, #tpu.memory_space<vmem>>) attributes {dimension_semantics = [#tpu.dimension_semantics<parallel>, #tpu.dimension_semantics<parallel>, #tpu.dimension_semantics<parallel>, #tpu.dimension_semantics<arbitrary>], iteration_bounds = array<i64: 1, 1, 1, 1>, scalar_prefetch = 0 : i64, scratch_operands = 1 : i64, tpu.core_type = #tpu.core_type<tc>, window_params = [{transform_indices = @transform_0, window_bounds = array<i64: 1, 8, 128>}, {transform_indices = @transform_1, window_bounds = array<i64: 1, 128, 128>}, {transform_indices = @transform_2, window_bounds = array<i64: 1, 8, 128>}, {transform_indices = @transform_3, window_bounds = array<i64: 1, 1, 8, 128>}]} {
    %c0_i32 = arith.constant 0 : i32
    %0 = arith.cmpi eq, %arg3, %c0_i32 : i32
    %1 = arith.extui %0 : i1 to i32
    %c0_i32_0 = arith.constant 0 : i32
    %2 = arith.cmpi ne, %1, %c0_i32_0 : i32
    scf.if %2 {
      %cst_11 = arith.constant 0.000000e+00 : f32
      %17 = vector.broadcast %cst_11 : f32 to vector<8x128xf32>
      %c0_12 = arith.constant 0 : index
      %c0_13 = arith.constant 0 : index
      %18 = vector.load %arg8[%c0_12, %c0_13] : memref<8x128xf32, #tpu.memory_space<vmem>>, vector<8x128xf32>
      tpu.vector_store %arg8[%c0_12, %c0_13], %17 {strides = array<i32>} : memref<8x128xf32, #tpu.memory_space<vmem>>, vector<8x128xf32>,
    } else {
    }
    %c128_i32 = arith.constant 128 : i32
    %3 = arith.muli %arg3, %c128_i32 : i32
    %4 = tpu.assume_multiple %3, 128 : i32
    %c0 = arith.constant 0 : index
    %5 = arith.index_cast %4 : i32 to index
    %c0_1 = arith.constant 0 : index
    %6 = vector.load %arg5[%c0, %5, %c0_1] : memref<1x128x128xbf16, #tpu.memory_space<vmem>>, vector<1x128x128xbf16>
    %7 = vector.shape_cast %6 : vector<1x128x128xbf16> to vector<128x128xbf16>
    %c0_2 = arith.constant 0 : index
    %c0_3 = arith.constant 0 : index
    %8 = vector.load %arg8[%c0_2, %c0_3] : memref<8x128xf32, #tpu.memory_space<vmem>>, vector<8x128xf32>
    %c0_4 = arith.constant 0 : index
    %c0_5 = arith.constant 0 : index
    %c0_6 = arith.constant 0 : index
    %9 = vector.load %arg4[%c0_4, %c0_5, %c0_6] : memref<1x8x128xbf16, #tpu.memory_space<vmem>>, vector<1x8x128xbf16>
    %10 = vector.shape_cast %9 : vector<1x8x128xbf16> to vector<8x128xbf16>
    %cst = arith.constant dense<0.000000e+00> : vector<8x128xf32>
    %11 = tpu.matmul %10, %7, %cst {dimension_numbers = #tpu.dot_dimension_numbers<[1], [0], [0], [1], [0, 0, 1, 1], [], []>} : vector<8x128xbf16>, vector<128x128xbf16>, vector<8x128xf32> -> vector<8x128xf32>
    %12 = arith.addf %8, %11 : vector<8x128xf32>
    %c0_7 = arith.constant 0 : index
    %c0_8 = arith.constant 0 : index
    %13 = vector.load %arg8[%c0_7, %c0_8] : memref<8x128xf32, #tpu.memory_space<vmem>>, vector<8x128xf32>
    tpu.vector_store %arg8[%c0_7, %c0_8], %12 {strides = array<i32>} : memref<8x128xf32, #tpu.memory_space<vmem>>, vector<8x128xf32>,
    %c0_i32_9 = arith.constant 0 : i32
    %14 = arith.cmpi eq, %arg3, %c0_i32_9 : i32
    %15 = arith.extui %14 : i1 to i32
    %c0_i32_10 = arith.constant 0 : i32
    %16 = arith.cmpi ne, %15, %c0_i32_10 : i32
    scf.if %16 {
      %c0_11 = arith.constant 0 : index
      %c0_12 = arith.constant 0 : index
      %17 = vector.load %arg8[%c0_11, %c0_12] : memref<8x128xf32, #tpu.memory_space<vmem>>, vector<8x128xf32>
      %18 = arith.truncf %17 : vector<8x128xf32> to vector<8x128xbf16>
      %19 = vector.shape_cast %18 : vector<8x128xbf16> to vector<1x8x128xbf16>
      %c0_13 = arith.constant 0 : index
      %c0_14 = arith.constant 0 : index
      %c0_15 = arith.constant 0 : index
      %20 = vector.load %arg6[%c0_13, %c0_14, %c0_15] : memref<1x8x128xbf16, #tpu.memory_space<vmem>>, vector<1x8x128xbf16>
      tpu.vector_store %arg6[%c0_13, %c0_14, %c0_15], %19 {strides = array<i32>} : memref<1x8x128xbf16, #tpu.memory_space<vmem>>, vector<1x8x128xbf16>,
      %cst_16 = arith.constant dense<0.000000e+00> : vector<128xf32>
      %21 = vector.multi_reduction <add>, %17, %cst_16 [0] : vector<8x128xf32> to vector<128xf32>
      %22 = vector.shape_cast %21 : vector<128xf32> to vector<1x128xf32>
      %23 = arith.mulf %17, %17 : vector<8x128xf32>
      %cst_17 = arith.constant dense<0.000000e+00> : vector<128xf32>
      %24 = vector.multi_reduction <add>, %23, %cst_17 [0] : vector<8x128xf32> to vector<128xf32>
      %25 = vector.shape_cast %24 : vector<128xf32> to vector<1x128xf32>
      %26 = tpu.iota {dimensions = array<i32: 0>} : vector<8x128xi32>
      %c0_i32_18 = arith.constant 0 : i32
      %27 = vector.broadcast %c0_i32_18 : i32 to vector<8x128xi32>
      %28 = arith.cmpi eq, %26, %27 : vector<8x128xi32>
      %c1_i32 = arith.constant 1 : i32
      %29 = vector.broadcast %c1_i32 : i32 to vector<8x128xi32>
      %30 = arith.cmpi eq, %26, %29 : vector<8x128xi32>
      %cst_19 = arith.constant 0.000000e+00 : f32
      %31 = vector.shape_cast %25 : vector<1x128xf32> to vector<1x128xf32>
      %32 = vector.broadcast %31 : vector<1x128xf32> to vector<8x128xf32>
      %33 = vector.broadcast %cst_19 : f32 to vector<8x128xf32>
      %34 = arith.select %30, %32, %33 : vector<8x128xi1>, vector<8x128xf32>
      %35 = vector.shape_cast %22 : vector<1x128xf32> to vector<1x128xf32>
      %36 = vector.broadcast %35 : vector<1x128xf32> to vector<8x128xf32>
      %37 = arith.select %28, %36, %34 : vector<8x128xi1>, vector<8x128xf32>
      %38 = vector.shape_cast %37 : vector<8x128xf32> to vector<1x1x8x128xf32>
      %c0_20 = arith.constant 0 : index
      %c0_21 = arith.constant 0 : index
      %c0_22 = arith.constant 0 : index
      %c0_23 = arith.constant 0 : index
      %39 = vector.load %arg7[%c0_20, %c0_21, %c0_22, %c0_23] : memref<1x1x8x128xf32, #tpu.memory_space<vmem>>, vector<1x1x8x128xf32>
      tpu.vector_store %arg7[%c0_20, %c0_21, %c0_22, %c0_23], %38 {strides = array<i32>} : memref<1x1x8x128xf32, #tpu.memory_space<vmem>>, vector<1x1x8x128xf32>,
    } else {
    }
    return
  }
  func.func @transform_0(%arg0: i32, %arg1: i32, %arg2: i32, %arg3: i32) -> (i32, i32, i32) {
    %c0_i32 = arith.constant 0 : i32
    return %arg0, %arg2, %arg3 : i32, i32, i32
  }
  func.func @transform_1(%arg0: i32, %arg1: i32, %arg2: i32, %arg3: i32) -> (i32, i32, i32) {
    %c0_i32 = arith.constant 0 : i32
    %c0_i32_0 = arith.constant 0 : i32
    return %arg0, %c0_i32, %arg1 : i32, i32, i32
  }
  func.func @transform_2(%arg0: i32, %arg1: i32, %arg2: i32, %arg3: i32) -> (i32, i32, i32) {
    %c0_i32 = arith.constant 0 : i32
    return %arg0, %arg2, %arg1 : i32, i32, i32
  }
  func.func @transform_3(%arg0: i32, %arg1: i32, %arg2: i32, %arg3: i32) -> (i32, i32, i32, i32) {
    %c0_i32 = arith.constant 0 : i32
    %c0_i32_0 = arith.constant 0 : i32
    return %arg0, %arg2, %c0_i32, %arg1 : i32, i32, i32, i32
  }
}

module attributes {stable_mosaic.version = 11 : i64} {
  func.func @_bn_lrelu_kernel(%arg0: i32, %arg1: i32, %arg2: i32, %arg3: memref<1x8x128xbf16, #tpu.memory_space<vmem>>, %arg4: memref<1x128xf32, #tpu.memory_space<vmem>>, %arg5: memref<1x128xf32, #tpu.memory_space<vmem>>, %arg6: memref<1x8x128xbf16, #tpu.memory_space<vmem>>) attributes {dimension_semantics = [#tpu.dimension_semantics<parallel>, #tpu.dimension_semantics<parallel>, #tpu.dimension_semantics<parallel>], iteration_bounds = array<i64: 1, 1, 1>, scalar_prefetch = 0 : i64, scratch_operands = 0 : i64, tpu.core_type = #tpu.core_type<tc>, window_params = [{transform_indices = @transform_0, window_bounds = array<i64: 1, 8, 128>}, {transform_indices = @transform_1, window_bounds = array<i64: 1, 128>}, {transform_indices = @transform_2, window_bounds = array<i64: 1, 128>}, {transform_indices = @transform_3, window_bounds = array<i64: 1, 8, 128>}]} {
    %c0 = arith.constant 0 : index
    %c0_0 = arith.constant 0 : index
    %c0_1 = arith.constant 0 : index
    %0 = vector.load %arg3[%c0, %c0_0, %c0_1] : memref<1x8x128xbf16, #tpu.memory_space<vmem>>, vector<1x8x128xbf16>
    %1 = vector.shape_cast %0 : vector<1x8x128xbf16> to vector<8x128xbf16>
    %2 = arith.extf %1 : vector<8x128xbf16> to vector<8x128xf32>
    %c0_2 = arith.constant 0 : index
    %c0_3 = arith.constant 0 : index
    %3 = vector.load %arg4[%c0_2, %c0_3] : memref<1x128xf32, #tpu.memory_space<vmem>>, vector<1x128xf32>
    %4 = vector.broadcast %3 : vector<1x128xf32> to vector<8x128xf32>
    %5 = arith.mulf %2, %4 : vector<8x128xf32>
    %c0_4 = arith.constant 0 : index
    %c0_5 = arith.constant 0 : index
    %6 = vector.load %arg5[%c0_4, %c0_5] : memref<1x128xf32, #tpu.memory_space<vmem>>, vector<1x128xf32>
    %7 = vector.broadcast %6 : vector<1x128xf32> to vector<8x128xf32>
    %8 = arith.addf %5, %7 : vector<8x128xf32>
    %cst = arith.constant 0.000000e+00 : f32
    %9 = vector.broadcast %cst : f32 to vector<8x128xf32>
    %10 = arith.cmpf oge, %8, %9 : vector<8x128xf32>
    %cst_6 = arith.constant 2.000000e-01 : f32
    %11 = vector.broadcast %cst_6 : f32 to vector<8x128xf32>
    %12 = arith.mulf %11, %8 : vector<8x128xf32>
    %13 = arith.select %10, %8, %12 : vector<8x128xi1>, vector<8x128xf32>
    %14 = arith.truncf %13 : vector<8x128xf32> to vector<8x128xbf16>
    %15 = vector.shape_cast %14 : vector<8x128xbf16> to vector<1x8x128xbf16>
    %c0_7 = arith.constant 0 : index
    %c0_8 = arith.constant 0 : index
    %c0_9 = arith.constant 0 : index
    %16 = vector.load %arg6[%c0_7, %c0_8, %c0_9] : memref<1x8x128xbf16, #tpu.memory_space<vmem>>, vector<1x8x128xbf16>
    tpu.vector_store %arg6[%c0_7, %c0_8, %c0_9], %15 {strides = array<i32>} : memref<1x8x128xbf16, #tpu.memory_space<vmem>>, vector<1x8x128xbf16>,
    return
  }
  func.func @transform_0(%arg0: i32, %arg1: i32, %arg2: i32) -> (i32, i32, i32) {
    %c0_i32 = arith.constant 0 : i32
    return %arg0, %arg1, %arg2 : i32, i32, i32
  }
  func.func @transform_1(%arg0: i32, %arg1: i32, %arg2: i32) -> (i32, i32) {
    %c0_i32 = arith.constant 0 : i32
    %c0_i32_0 = arith.constant 0 : i32
    return %c0_i32, %arg2 : i32, i32
  }
  func.func @transform_2(%arg0: i32, %arg1: i32, %arg2: i32) -> (i32, i32) {
    %c0_i32 = arith.constant 0 : i32
    %c0_i32_0 = arith.constant 0 : i32
    return %c0_i32, %arg2 : i32, i32
  }
  func.func @transform_3(%arg0: i32, %arg1: i32, %arg2: i32) -> (i32, i32, i32) {
    %c0_i32 = arith.constant 0 : i32
    return %arg0, %arg1, %arg2 : i32, i32, i32
  }
}

module attributes {stable_mosaic.version = 11 : i64} {
  func.func @_mm_stats_kernel(%arg0: i32, %arg1: i32, %arg2: i32, %arg3: i32, %arg4: memref<1x8x128xbf16, #tpu.memory_space<vmem>>, %arg5: memref<1x128x128xbf16, #tpu.memory_space<vmem>>, %arg6: memref<1x8x128xbf16, #tpu.memory_space<vmem>>, %arg7: memref<1x1x8x128xf32, #tpu.memory_space<vmem>>, %arg8: memref<8x128xf32, #tpu.memory_space<vmem>>) attributes {dimension_semantics = [#tpu.dimension_semantics<parallel>, #tpu.dimension_semantics<parallel>, #tpu.dimension_semantics<parallel>, #tpu.dimension_semantics<arbitrary>], iteration_bounds = array<i64: 4, 1, 1, 1>, scalar_prefetch = 0 : i64, scratch_operands = 1 : i64, tpu.core_type = #tpu.core_type<tc>, window_params = [{transform_indices = @transform_0, window_bounds = array<i64: 1, 8, 128>}, {transform_indices = @transform_1, window_bounds = array<i64: 1, 128, 128>}, {transform_indices = @transform_2, window_bounds = array<i64: 1, 8, 128>}, {transform_indices = @transform_3, window_bounds = array<i64: 1, 1, 8, 128>}]} {
    %c0_i32 = arith.constant 0 : i32
    %0 = arith.cmpi eq, %arg3, %c0_i32 : i32
    %1 = arith.extui %0 : i1 to i32
    %c0_i32_0 = arith.constant 0 : i32
    %2 = arith.cmpi ne, %1, %c0_i32_0 : i32
    scf.if %2 {
      %cst_11 = arith.constant 0.000000e+00 : f32
      %17 = vector.broadcast %cst_11 : f32 to vector<8x128xf32>
      %c0_12 = arith.constant 0 : index
      %c0_13 = arith.constant 0 : index
      %18 = vector.load %arg8[%c0_12, %c0_13] : memref<8x128xf32, #tpu.memory_space<vmem>>, vector<8x128xf32>
      tpu.vector_store %arg8[%c0_12, %c0_13], %17 {strides = array<i32>} : memref<8x128xf32, #tpu.memory_space<vmem>>, vector<8x128xf32>,
    } else {
    }
    %c128_i32 = arith.constant 128 : i32
    %3 = arith.muli %arg3, %c128_i32 : i32
    %4 = tpu.assume_multiple %3, 128 : i32
    %c0 = arith.constant 0 : index
    %5 = arith.index_cast %4 : i32 to index
    %c0_1 = arith.constant 0 : index
    %6 = vector.load %arg5[%c0, %5, %c0_1] : memref<1x128x128xbf16, #tpu.memory_space<vmem>>, vector<1x128x128xbf16>
    %7 = vector.shape_cast %6 : vector<1x128x128xbf16> to vector<128x128xbf16>
    %c0_2 = arith.constant 0 : index
    %c0_3 = arith.constant 0 : index
    %8 = vector.load %arg8[%c0_2, %c0_3] : memref<8x128xf32, #tpu.memory_space<vmem>>, vector<8x128xf32>
    %c0_4 = arith.constant 0 : index
    %c0_5 = arith.constant 0 : index
    %c0_6 = arith.constant 0 : index
    %9 = vector.load %arg4[%c0_4, %c0_5, %c0_6] : memref<1x8x128xbf16, #tpu.memory_space<vmem>>, vector<1x8x128xbf16>
    %10 = vector.shape_cast %9 : vector<1x8x128xbf16> to vector<8x128xbf16>
    %cst = arith.constant dense<0.000000e+00> : vector<8x128xf32>
    %11 = tpu.matmul %10, %7, %cst {dimension_numbers = #tpu.dot_dimension_numbers<[1], [0], [0], [1], [0, 0, 1, 1], [], []>} : vector<8x128xbf16>, vector<128x128xbf16>, vector<8x128xf32> -> vector<8x128xf32>
    %12 = arith.addf %8, %11 : vector<8x128xf32>
    %c0_7 = arith.constant 0 : index
    %c0_8 = arith.constant 0 : index
    %13 = vector.load %arg8[%c0_7, %c0_8] : memref<8x128xf32, #tpu.memory_space<vmem>>, vector<8x128xf32>
    tpu.vector_store %arg8[%c0_7, %c0_8], %12 {strides = array<i32>} : memref<8x128xf32, #tpu.memory_space<vmem>>, vector<8x128xf32>,
    %c0_i32_9 = arith.constant 0 : i32
    %14 = arith.cmpi eq, %arg3, %c0_i32_9 : i32
    %15 = arith.extui %14 : i1 to i32
    %c0_i32_10 = arith.constant 0 : i32
    %16 = arith.cmpi ne, %15, %c0_i32_10 : i32
    scf.if %16 {
      %c0_11 = arith.constant 0 : index
      %c0_12 = arith.constant 0 : index
      %17 = vector.load %arg8[%c0_11, %c0_12] : memref<8x128xf32, #tpu.memory_space<vmem>>, vector<8x128xf32>
      %18 = arith.truncf %17 : vector<8x128xf32> to vector<8x128xbf16>
      %19 = vector.shape_cast %18 : vector<8x128xbf16> to vector<1x8x128xbf16>
      %c0_13 = arith.constant 0 : index
      %c0_14 = arith.constant 0 : index
      %c0_15 = arith.constant 0 : index
      %20 = vector.load %arg6[%c0_13, %c0_14, %c0_15] : memref<1x8x128xbf16, #tpu.memory_space<vmem>>, vector<1x8x128xbf16>
      tpu.vector_store %arg6[%c0_13, %c0_14, %c0_15], %19 {strides = array<i32>} : memref<1x8x128xbf16, #tpu.memory_space<vmem>>, vector<1x8x128xbf16>,
      %cst_16 = arith.constant dense<0.000000e+00> : vector<128xf32>
      %21 = vector.multi_reduction <add>, %17, %cst_16 [0] : vector<8x128xf32> to vector<128xf32>
      %22 = vector.shape_cast %21 : vector<128xf32> to vector<1x128xf32>
      %23 = arith.mulf %17, %17 : vector<8x128xf32>
      %cst_17 = arith.constant dense<0.000000e+00> : vector<128xf32>
      %24 = vector.multi_reduction <add>, %23, %cst_17 [0] : vector<8x128xf32> to vector<128xf32>
      %25 = vector.shape_cast %24 : vector<128xf32> to vector<1x128xf32>
      %26 = tpu.iota {dimensions = array<i32: 0>} : vector<8x128xi32>
      %c0_i32_18 = arith.constant 0 : i32
      %27 = vector.broadcast %c0_i32_18 : i32 to vector<8x128xi32>
      %28 = arith.cmpi eq, %26, %27 : vector<8x128xi32>
      %c1_i32 = arith.constant 1 : i32
      %29 = vector.broadcast %c1_i32 : i32 to vector<8x128xi32>
      %30 = arith.cmpi eq, %26, %29 : vector<8x128xi32>
      %cst_19 = arith.constant 0.000000e+00 : f32
      %31 = vector.shape_cast %25 : vector<1x128xf32> to vector<1x128xf32>
      %32 = vector.broadcast %31 : vector<1x128xf32> to vector<8x128xf32>
      %33 = vector.broadcast %cst_19 : f32 to vector<8x128xf32>
      %34 = arith.select %30, %32, %33 : vector<8x128xi1>, vector<8x128xf32>
      %35 = vector.shape_cast %22 : vector<1x128xf32> to vector<1x128xf32>
      %36 = vector.broadcast %35 : vector<1x128xf32> to vector<8x128xf32>
      %37 = arith.select %28, %36, %34 : vector<8x128xi1>, vector<8x128xf32>
      %38 = vector.shape_cast %37 : vector<8x128xf32> to vector<1x1x8x128xf32>
      %c0_20 = arith.constant 0 : index
      %c0_21 = arith.constant 0 : index
      %c0_22 = arith.constant 0 : index
      %c0_23 = arith.constant 0 : index
      %39 = vector.load %arg7[%c0_20, %c0_21, %c0_22, %c0_23] : memref<1x1x8x128xf32, #tpu.memory_space<vmem>>, vector<1x1x8x128xf32>
      tpu.vector_store %arg7[%c0_20, %c0_21, %c0_22, %c0_23], %38 {strides = array<i32>} : memref<1x1x8x128xf32, #tpu.memory_space<vmem>>, vector<1x1x8x128xf32>,
    } else {
    }
    return
  }
  func.func @transform_0(%arg0: i32, %arg1: i32, %arg2: i32, %arg3: i32) -> (i32, i32, i32) {
    %c0_i32 = arith.constant 0 : i32
    return %arg0, %arg2, %arg3 : i32, i32, i32
  }
  func.func @transform_1(%arg0: i32, %arg1: i32, %arg2: i32, %arg3: i32) -> (i32, i32, i32) {
    %c0_i32 = arith.constant 0 : i32
    %c0_i32_0 = arith.constant 0 : i32
    return %arg0, %c0_i32, %arg1 : i32, i32, i32
  }
  func.func @transform_2(%arg0: i32, %arg1: i32, %arg2: i32, %arg3: i32) -> (i32, i32, i32) {
    %c0_i32 = arith.constant 0 : i32
    return %arg0, %arg2, %arg1 : i32, i32, i32
  }
  func.func @transform_3(%arg0: i32, %arg1: i32, %arg2: i32, %arg3: i32) -> (i32, i32, i32, i32) {
    %c0_i32 = arith.constant 0 : i32
    %c0_i32_0 = arith.constant 0 : i32
    return %arg0, %arg2, %c0_i32, %arg1 : i32, i32, i32, i32
  }
}

module attributes {stable_mosaic.version = 11 : i64} {
  func.func @_finalize_bn_kernel(%arg0: memref<4x1x8x128xf32, #tpu.memory_space<vmem>>, %arg1: memref<1x128xf32, #tpu.memory_space<vmem>>, %arg2: memref<1x128xf32, #tpu.memory_space<vmem>>, %arg3: memref<1x128xf32, #tpu.memory_space<vmem>>, %arg4: memref<1x128xf32, #tpu.memory_space<vmem>>) attributes {dimension_semantics = [], scalar_prefetch = 0 : i64, scratch_operands = 0 : i64, tpu.core_type = #tpu.core_type<tc>} {
    %c0 = arith.constant 0 : index
    %c0_0 = arith.constant 0 : index
    %c0_1 = arith.constant 0 : index
    %c0_2 = arith.constant 0 : index
    %0 = vector.load %arg0[%c0, %c0_0, %c0_1, %c0_2] : memref<4x1x8x128xf32, #tpu.memory_space<vmem>>, vector<4x1x8x128xf32>
    %cst = arith.constant dense<0.000000e+00> : vector<8x128xf32>
    %1 = vector.multi_reduction <add>, %0, %cst [0, 1] : vector<4x1x8x128xf32> to vector<8x128xf32>
    %2 = vector.extract_strided_slice %1 {offsets = [0, 0], sizes = [1, 128], strides = [1, 1]} : vector<8x128xf32> to vector<1x128xf32>
    %cst_3 = arith.constant 3.125000e-02 : f32
    %3 = vector.broadcast %cst_3 : f32 to vector<1x128xf32>
    %4 = arith.mulf %2, %3 : vector<1x128xf32>
    %5 = vector.extract_strided_slice %1 {offsets = [1, 0], sizes = [1, 128], strides = [1, 1]} : vector<8x128xf32> to vector<1x128xf32>
    %cst_4 = arith.constant 3.125000e-02 : f32
    %6 = vector.broadcast %cst_4 : f32 to vector<1x128xf32>
    %7 = arith.mulf %5, %6 : vector<1x128xf32>
    %8 = arith.mulf %4, %4 : vector<1x128xf32>
    %9 = arith.subf %7, %8 : vector<1x128xf32>
    %cst_5 = arith.constant 0.000000e+00 : f32
    %10 = vector.broadcast %cst_5 : f32 to vector<1x128xf32>
    %11 = arith.maximumf %9, %10 : vector<1x128xf32>
    %c0_6 = arith.constant 0 : index
    %c0_7 = arith.constant 0 : index
    %12 = vector.load %arg1[%c0_6, %c0_7] : memref<1x128xf32, #tpu.memory_space<vmem>>, vector<1x128xf32>
    %cst_8 = arith.constant 9.99999974E-6 : f32
    %13 = vector.broadcast %cst_8 : f32 to vector<1x128xf32>
    %14 = arith.addf %11, %13 : vector<1x128xf32>
    %15 = math.rsqrt %14 : vector<1x128xf32>
    %16 = arith.mulf %12, %15 : vector<1x128xf32>
    %c0_9 = arith.constant 0 : index
    %c0_10 = arith.constant 0 : index
    %17 = vector.load %arg3[%c0_9, %c0_10] : memref<1x128xf32, #tpu.memory_space<vmem>>, vector<1x128xf32>
    tpu.vector_store %arg3[%c0_9, %c0_10], %16 {strides = array<i32>} : memref<1x128xf32, #tpu.memory_space<vmem>>, vector<1x128xf32>,
    %c0_11 = arith.constant 0 : index
    %c0_12 = arith.constant 0 : index
    %18 = vector.load %arg2[%c0_11, %c0_12] : memref<1x128xf32, #tpu.memory_space<vmem>>, vector<1x128xf32>
    %19 = arith.mulf %4, %16 : vector<1x128xf32>
    %20 = arith.subf %18, %19 : vector<1x128xf32>
    %c0_13 = arith.constant 0 : index
    %c0_14 = arith.constant 0 : index
    %21 = vector.load %arg4[%c0_13, %c0_14] : memref<1x128xf32, #tpu.memory_space<vmem>>, vector<1x128xf32>
    tpu.vector_store %arg4[%c0_13, %c0_14], %20 {strides = array<i32>} : memref<1x128xf32, #tpu.memory_space<vmem>>, vector<1x128xf32>,
    return
  }
}

module attributes {stable_mosaic.version = 11 : i64} {
  func.func @_bn_lrelu_kernel(%arg0: i32, %arg1: i32, %arg2: i32, %arg3: memref<1x8x128xbf16, #tpu.memory_space<vmem>>, %arg4: memref<1x128xf32, #tpu.memory_space<vmem>>, %arg5: memref<1x128xf32, #tpu.memory_space<vmem>>, %arg6: memref<1x8x128xbf16, #tpu.memory_space<vmem>>) attributes {dimension_semantics = [#tpu.dimension_semantics<parallel>, #tpu.dimension_semantics<parallel>, #tpu.dimension_semantics<parallel>], iteration_bounds = array<i64: 4, 1, 1>, scalar_prefetch = 0 : i64, scratch_operands = 0 : i64, tpu.core_type = #tpu.core_type<tc>, window_params = [{transform_indices = @transform_0, window_bounds = array<i64: 1, 8, 128>}, {transform_indices = @transform_1, window_bounds = array<i64: 1, 128>}, {transform_indices = @transform_2, window_bounds = array<i64: 1, 128>}, {transform_indices = @transform_3, window_bounds = array<i64: 1, 8, 128>}]} {
    %c0 = arith.constant 0 : index
    %c0_0 = arith.constant 0 : index
    %c0_1 = arith.constant 0 : index
    %0 = vector.load %arg3[%c0, %c0_0, %c0_1] : memref<1x8x128xbf16, #tpu.memory_space<vmem>>, vector<1x8x128xbf16>
    %1 = vector.shape_cast %0 : vector<1x8x128xbf16> to vector<8x128xbf16>
    %2 = arith.extf %1 : vector<8x128xbf16> to vector<8x128xf32>
    %c0_2 = arith.constant 0 : index
    %c0_3 = arith.constant 0 : index
    %3 = vector.load %arg4[%c0_2, %c0_3] : memref<1x128xf32, #tpu.memory_space<vmem>>, vector<1x128xf32>
    %4 = vector.broadcast %3 : vector<1x128xf32> to vector<8x128xf32>
    %5 = arith.mulf %2, %4 : vector<8x128xf32>
    %c0_4 = arith.constant 0 : index
    %c0_5 = arith.constant 0 : index
    %6 = vector.load %arg5[%c0_4, %c0_5] : memref<1x128xf32, #tpu.memory_space<vmem>>, vector<1x128xf32>
    %7 = vector.broadcast %6 : vector<1x128xf32> to vector<8x128xf32>
    %8 = arith.addf %5, %7 : vector<8x128xf32>
    %cst = arith.constant 0.000000e+00 : f32
    %9 = vector.broadcast %cst : f32 to vector<8x128xf32>
    %10 = arith.cmpf oge, %8, %9 : vector<8x128xf32>
    %cst_6 = arith.constant 2.000000e-01 : f32
    %11 = vector.broadcast %cst_6 : f32 to vector<8x128xf32>
    %12 = arith.mulf %11, %8 : vector<8x128xf32>
    %13 = arith.select %10, %8, %12 : vector<8x128xi1>, vector<8x128xf32>
    %14 = arith.truncf %13 : vector<8x128xf32> to vector<8x128xbf16>
    %15 = vector.shape_cast %14 : vector<8x128xbf16> to vector<1x8x128xbf16>
    %c0_7 = arith.constant 0 : index
    %c0_8 = arith.constant 0 : index
    %c0_9 = arith.constant 0 : index
    %16 = vector.load %arg6[%c0_7, %c0_8, %c0_9] : memref<1x8x128xbf16, #tpu.memory_space<vmem>>, vector<1x8x128xbf16>
    tpu.vector_store %arg6[%c0_7, %c0_8, %c0_9], %15 {strides = array<i32>} : memref<1x8x128xbf16, #tpu.memory_space<vmem>>, vector<1x8x128xbf16>,
    return
  }
  func.func @transform_0(%arg0: i32, %arg1: i32, %arg2: i32) -> (i32, i32, i32) {
    %c0_i32 = arith.constant 0 : i32
    return %arg0, %arg1, %arg2 : i32, i32, i32
  }
  func.func @transform_1(%arg0: i32, %arg1: i32, %arg2: i32) -> (i32, i32) {
    %c0_i32 = arith.constant 0 : i32
    %c0_i32_0 = arith.constant 0 : i32
    return %c0_i32, %arg2 : i32, i32
  }
  func.func @transform_2(%arg0: i32, %arg1: i32, %arg2: i32) -> (i32, i32) {
    %c0_i32 = arith.constant 0 : i32
    %c0_i32_0 = arith.constant 0 : i32
    return %c0_i32, %arg2 : i32, i32
  }
  func.func @transform_3(%arg0: i32, %arg1: i32, %arg2: i32) -> (i32, i32, i32) {
    %c0_i32 = arith.constant 0 : i32
    return %arg0, %arg1, %arg2 : i32, i32, i32
  }
}

module attributes {stable_mosaic.version = 11 : i64} {
  func.func @_mm_stats_kernel(%arg0: i32, %arg1: i32, %arg2: i32, %arg3: i32, %arg4: memref<1x32x128xbf16, #tpu.memory_space<vmem>>, %arg5: memref<1x128x128xbf16, #tpu.memory_space<vmem>>, %arg6: memref<1x32x128xbf16, #tpu.memory_space<vmem>>, %arg7: memref<1x1x8x128xf32, #tpu.memory_space<vmem>>, %arg8: memref<32x128xf32, #tpu.memory_space<vmem>>) attributes {dimension_semantics = [#tpu.dimension_semantics<parallel>, #tpu.dimension_semantics<parallel>, #tpu.dimension_semantics<parallel>, #tpu.dimension_semantics<arbitrary>], iteration_bounds = array<i64: 4, 1, 1, 1>, scalar_prefetch = 0 : i64, scratch_operands = 1 : i64, tpu.core_type = #tpu.core_type<tc>, window_params = [{transform_indices = @transform_0, window_bounds = array<i64: 1, 32, 128>}, {transform_indices = @transform_1, window_bounds = array<i64: 1, 128, 128>}, {transform_indices = @transform_2, window_bounds = array<i64: 1, 32, 128>}, {transform_indices = @transform_3, window_bounds = array<i64: 1, 1, 8, 128>}]} {
    %c0_i32 = arith.constant 0 : i32
    %0 = arith.cmpi eq, %arg3, %c0_i32 : i32
    %1 = arith.extui %0 : i1 to i32
    %c0_i32_0 = arith.constant 0 : i32
    %2 = arith.cmpi ne, %1, %c0_i32_0 : i32
    scf.if %2 {
      %cst_11 = arith.constant 0.000000e+00 : f32
      %17 = vector.broadcast %cst_11 : f32 to vector<32x128xf32>
      %c0_12 = arith.constant 0 : index
      %c0_13 = arith.constant 0 : index
      %18 = vector.load %arg8[%c0_12, %c0_13] : memref<32x128xf32, #tpu.memory_space<vmem>>, vector<32x128xf32>
      tpu.vector_store %arg8[%c0_12, %c0_13], %17 {strides = array<i32>} : memref<32x128xf32, #tpu.memory_space<vmem>>, vector<32x128xf32>,
    } else {
    }
    %c128_i32 = arith.constant 128 : i32
    %3 = arith.muli %arg3, %c128_i32 : i32
    %4 = tpu.assume_multiple %3, 128 : i32
    %c0 = arith.constant 0 : index
    %5 = arith.index_cast %4 : i32 to index
    %c0_1 = arith.constant 0 : index
    %6 = vector.load %arg5[%c0, %5, %c0_1] : memref<1x128x128xbf16, #tpu.memory_space<vmem>>, vector<1x128x128xbf16>
    %7 = vector.shape_cast %6 : vector<1x128x128xbf16> to vector<128x128xbf16>
    %c0_2 = arith.constant 0 : index
    %c0_3 = arith.constant 0 : index
    %8 = vector.load %arg8[%c0_2, %c0_3] : memref<32x128xf32, #tpu.memory_space<vmem>>, vector<32x128xf32>
    %c0_4 = arith.constant 0 : index
    %c0_5 = arith.constant 0 : index
    %c0_6 = arith.constant 0 : index
    %9 = vector.load %arg4[%c0_4, %c0_5, %c0_6] : memref<1x32x128xbf16, #tpu.memory_space<vmem>>, vector<1x32x128xbf16>
    %10 = vector.shape_cast %9 : vector<1x32x128xbf16> to vector<32x128xbf16>
    %cst = arith.constant dense<0.000000e+00> : vector<32x128xf32>
    %11 = tpu.matmul %10, %7, %cst {dimension_numbers = #tpu.dot_dimension_numbers<[1], [0], [0], [1], [0, 0, 1, 1], [], []>} : vector<32x128xbf16>, vector<128x128xbf16>, vector<32x128xf32> -> vector<32x128xf32>
    %12 = arith.addf %8, %11 : vector<32x128xf32>
    %c0_7 = arith.constant 0 : index
    %c0_8 = arith.constant 0 : index
    %13 = vector.load %arg8[%c0_7, %c0_8] : memref<32x128xf32, #tpu.memory_space<vmem>>, vector<32x128xf32>
    tpu.vector_store %arg8[%c0_7, %c0_8], %12 {strides = array<i32>} : memref<32x128xf32, #tpu.memory_space<vmem>>, vector<32x128xf32>,
    %c0_i32_9 = arith.constant 0 : i32
    %14 = arith.cmpi eq, %arg3, %c0_i32_9 : i32
    %15 = arith.extui %14 : i1 to i32
    %c0_i32_10 = arith.constant 0 : i32
    %16 = arith.cmpi ne, %15, %c0_i32_10 : i32
    scf.if %16 {
      %c0_11 = arith.constant 0 : index
      %c0_12 = arith.constant 0 : index
      %17 = vector.load %arg8[%c0_11, %c0_12] : memref<32x128xf32, #tpu.memory_space<vmem>>, vector<32x128xf32>
      %18 = arith.truncf %17 : vector<32x128xf32> to vector<32x128xbf16>
      %19 = vector.shape_cast %18 : vector<32x128xbf16> to vector<1x32x128xbf16>
      %c0_13 = arith.constant 0 : index
      %c0_14 = arith.constant 0 : index
      %c0_15 = arith.constant 0 : index
      %20 = vector.load %arg6[%c0_13, %c0_14, %c0_15] : memref<1x32x128xbf16, #tpu.memory_space<vmem>>, vector<1x32x128xbf16>
      tpu.vector_store %arg6[%c0_13, %c0_14, %c0_15], %19 {strides = array<i32>} : memref<1x32x128xbf16, #tpu.memory_space<vmem>>, vector<1x32x128xbf16>,
      %cst_16 = arith.constant dense<0.000000e+00> : vector<128xf32>
      %21 = vector.multi_reduction <add>, %17, %cst_16 [0] : vector<32x128xf32> to vector<128xf32>
      %22 = vector.shape_cast %21 : vector<128xf32> to vector<1x128xf32>
      %23 = arith.mulf %17, %17 : vector<32x128xf32>
      %cst_17 = arith.constant dense<0.000000e+00> : vector<128xf32>
      %24 = vector.multi_reduction <add>, %23, %cst_17 [0] : vector<32x128xf32> to vector<128xf32>
      %25 = vector.shape_cast %24 : vector<128xf32> to vector<1x128xf32>
      %26 = tpu.iota {dimensions = array<i32: 0>} : vector<8x128xi32>
      %c0_i32_18 = arith.constant 0 : i32
      %27 = vector.broadcast %c0_i32_18 : i32 to vector<8x128xi32>
      %28 = arith.cmpi eq, %26, %27 : vector<8x128xi32>
      %c1_i32 = arith.constant 1 : i32
      %29 = vector.broadcast %c1_i32 : i32 to vector<8x128xi32>
      %30 = arith.cmpi eq, %26, %29 : vector<8x128xi32>
      %cst_19 = arith.constant 0.000000e+00 : f32
      %31 = vector.shape_cast %25 : vector<1x128xf32> to vector<1x128xf32>
      %32 = vector.broadcast %31 : vector<1x128xf32> to vector<8x128xf32>
      %33 = vector.broadcast %cst_19 : f32 to vector<8x128xf32>
      %34 = arith.select %30, %32, %33 : vector<8x128xi1>, vector<8x128xf32>
      %35 = vector.shape_cast %22 : vector<1x128xf32> to vector<1x128xf32>
      %36 = vector.broadcast %35 : vector<1x128xf32> to vector<8x128xf32>
      %37 = arith.select %28, %36, %34 : vector<8x128xi1>, vector<8x128xf32>
      %38 = vector.shape_cast %37 : vector<8x128xf32> to vector<1x1x8x128xf32>
      %c0_20 = arith.constant 0 : index
      %c0_21 = arith.constant 0 : index
      %c0_22 = arith.constant 0 : index
      %c0_23 = arith.constant 0 : index
      %39 = vector.load %arg7[%c0_20, %c0_21, %c0_22, %c0_23] : memref<1x1x8x128xf32, #tpu.memory_space<vmem>>, vector<1x1x8x128xf32>
      tpu.vector_store %arg7[%c0_20, %c0_21, %c0_22, %c0_23], %38 {strides = array<i32>} : memref<1x1x8x128xf32, #tpu.memory_space<vmem>>, vector<1x1x8x128xf32>,
    } else {
    }
    return
  }
  func.func @transform_0(%arg0: i32, %arg1: i32, %arg2: i32, %arg3: i32) -> (i32, i32, i32) {
    %c0_i32 = arith.constant 0 : i32
    return %arg0, %arg2, %arg3 : i32, i32, i32
  }
  func.func @transform_1(%arg0: i32, %arg1: i32, %arg2: i32, %arg3: i32) -> (i32, i32, i32) {
    %c0_i32 = arith.constant 0 : i32
    %c0_i32_0 = arith.constant 0 : i32
    return %arg0, %c0_i32, %arg1 : i32, i32, i32
  }
  func.func @transform_2(%arg0: i32, %arg1: i32, %arg2: i32, %arg3: i32) -> (i32, i32, i32) {
    %c0_i32 = arith.constant 0 : i32
    return %arg0, %arg2, %arg1 : i32, i32, i32
  }
  func.func @transform_3(%arg0: i32, %arg1: i32, %arg2: i32, %arg3: i32) -> (i32, i32, i32, i32) {
    %c0_i32 = arith.constant 0 : i32
    %c0_i32_0 = arith.constant 0 : i32
    return %arg0, %arg2, %c0_i32, %arg1 : i32, i32, i32, i32
  }
}

module attributes {stable_mosaic.version = 11 : i64} {
  func.func @_finalize_bn_kernel(%arg0: memref<4x1x8x128xf32, #tpu.memory_space<vmem>>, %arg1: memref<1x128xf32, #tpu.memory_space<vmem>>, %arg2: memref<1x128xf32, #tpu.memory_space<vmem>>, %arg3: memref<1x128xf32, #tpu.memory_space<vmem>>, %arg4: memref<1x128xf32, #tpu.memory_space<vmem>>) attributes {dimension_semantics = [], scalar_prefetch = 0 : i64, scratch_operands = 0 : i64, tpu.core_type = #tpu.core_type<tc>} {
    %c0 = arith.constant 0 : index
    %c0_0 = arith.constant 0 : index
    %c0_1 = arith.constant 0 : index
    %c0_2 = arith.constant 0 : index
    %0 = vector.load %arg0[%c0, %c0_0, %c0_1, %c0_2] : memref<4x1x8x128xf32, #tpu.memory_space<vmem>>, vector<4x1x8x128xf32>
    %cst = arith.constant dense<0.000000e+00> : vector<8x128xf32>
    %1 = vector.multi_reduction <add>, %0, %cst [0, 1] : vector<4x1x8x128xf32> to vector<8x128xf32>
    %2 = vector.extract_strided_slice %1 {offsets = [0, 0], sizes = [1, 128], strides = [1, 1]} : vector<8x128xf32> to vector<1x128xf32>
    %cst_3 = arith.constant 7.812500e-03 : f32
    %3 = vector.broadcast %cst_3 : f32 to vector<1x128xf32>
    %4 = arith.mulf %2, %3 : vector<1x128xf32>
    %5 = vector.extract_strided_slice %1 {offsets = [1, 0], sizes = [1, 128], strides = [1, 1]} : vector<8x128xf32> to vector<1x128xf32>
    %cst_4 = arith.constant 7.812500e-03 : f32
    %6 = vector.broadcast %cst_4 : f32 to vector<1x128xf32>
    %7 = arith.mulf %5, %6 : vector<1x128xf32>
    %8 = arith.mulf %4, %4 : vector<1x128xf32>
    %9 = arith.subf %7, %8 : vector<1x128xf32>
    %cst_5 = arith.constant 0.000000e+00 : f32
    %10 = vector.broadcast %cst_5 : f32 to vector<1x128xf32>
    %11 = arith.maximumf %9, %10 : vector<1x128xf32>
    %c0_6 = arith.constant 0 : index
    %c0_7 = arith.constant 0 : index
    %12 = vector.load %arg1[%c0_6, %c0_7] : memref<1x128xf32, #tpu.memory_space<vmem>>, vector<1x128xf32>
    %cst_8 = arith.constant 9.99999974E-6 : f32
    %13 = vector.broadcast %cst_8 : f32 to vector<1x128xf32>
    %14 = arith.addf %11, %13 : vector<1x128xf32>
    %15 = math.rsqrt %14 : vector<1x128xf32>
    %16 = arith.mulf %12, %15 : vector<1x128xf32>
    %c0_9 = arith.constant 0 : index
    %c0_10 = arith.constant 0 : index
    %17 = vector.load %arg3[%c0_9, %c0_10] : memref<1x128xf32, #tpu.memory_space<vmem>>, vector<1x128xf32>
    tpu.vector_store %arg3[%c0_9, %c0_10], %16 {strides = array<i32>} : memref<1x128xf32, #tpu.memory_space<vmem>>, vector<1x128xf32>,
    %c0_11 = arith.constant 0 : index
    %c0_12 = arith.constant 0 : index
    %18 = vector.load %arg2[%c0_11, %c0_12] : memref<1x128xf32, #tpu.memory_space<vmem>>, vector<1x128xf32>
    %19 = arith.mulf %4, %16 : vector<1x128xf32>
    %20 = arith.subf %18, %19 : vector<1x128xf32>
    %c0_13 = arith.constant 0 : index
    %c0_14 = arith.constant 0 : index
    %21 = vector.load %arg4[%c0_13, %c0_14] : memref<1x128xf32, #tpu.memory_space<vmem>>, vector<1x128xf32>
    tpu.vector_store %arg4[%c0_13, %c0_14], %20 {strides = array<i32>} : memref<1x128xf32, #tpu.memory_space<vmem>>, vector<1x128xf32>,
    return
  }
}

module attributes {stable_mosaic.version = 11 : i64} {
  func.func @_bn_lrelu_kernel(%arg0: i32, %arg1: i32, %arg2: i32, %arg3: memref<1x32x128xbf16, #tpu.memory_space<vmem>>, %arg4: memref<1x128xf32, #tpu.memory_space<vmem>>, %arg5: memref<1x128xf32, #tpu.memory_space<vmem>>, %arg6: memref<1x32x128xbf16, #tpu.memory_space<vmem>>) attributes {dimension_semantics = [#tpu.dimension_semantics<parallel>, #tpu.dimension_semantics<parallel>, #tpu.dimension_semantics<parallel>], iteration_bounds = array<i64: 4, 1, 1>, scalar_prefetch = 0 : i64, scratch_operands = 0 : i64, tpu.core_type = #tpu.core_type<tc>, window_params = [{transform_indices = @transform_0, window_bounds = array<i64: 1, 32, 128>}, {transform_indices = @transform_1, window_bounds = array<i64: 1, 128>}, {transform_indices = @transform_2, window_bounds = array<i64: 1, 128>}, {transform_indices = @transform_3, window_bounds = array<i64: 1, 32, 128>}]} {
    %c0 = arith.constant 0 : index
    %c0_0 = arith.constant 0 : index
    %c0_1 = arith.constant 0 : index
    %0 = vector.load %arg3[%c0, %c0_0, %c0_1] : memref<1x32x128xbf16, #tpu.memory_space<vmem>>, vector<1x32x128xbf16>
    %1 = vector.shape_cast %0 : vector<1x32x128xbf16> to vector<32x128xbf16>
    %2 = arith.extf %1 : vector<32x128xbf16> to vector<32x128xf32>
    %c0_2 = arith.constant 0 : index
    %c0_3 = arith.constant 0 : index
    %3 = vector.load %arg4[%c0_2, %c0_3] : memref<1x128xf32, #tpu.memory_space<vmem>>, vector<1x128xf32>
    %4 = vector.broadcast %3 : vector<1x128xf32> to vector<32x128xf32>
    %5 = arith.mulf %2, %4 : vector<32x128xf32>
    %c0_4 = arith.constant 0 : index
    %c0_5 = arith.constant 0 : index
    %6 = vector.load %arg5[%c0_4, %c0_5] : memref<1x128xf32, #tpu.memory_space<vmem>>, vector<1x128xf32>
    %7 = vector.broadcast %6 : vector<1x128xf32> to vector<32x128xf32>
    %8 = arith.addf %5, %7 : vector<32x128xf32>
    %cst = arith.constant 0.000000e+00 : f32
    %9 = vector.broadcast %cst : f32 to vector<32x128xf32>
    %10 = arith.cmpf oge, %8, %9 : vector<32x128xf32>
    %cst_6 = arith.constant 2.000000e-01 : f32
    %11 = vector.broadcast %cst_6 : f32 to vector<32x128xf32>
    %12 = arith.mulf %11, %8 : vector<32x128xf32>
    %13 = arith.select %10, %8, %12 : vector<32x128xi1>, vector<32x128xf32>
    %14 = arith.truncf %13 : vector<32x128xf32> to vector<32x128xbf16>
    %15 = vector.shape_cast %14 : vector<32x128xbf16> to vector<1x32x128xbf16>
    %c0_7 = arith.constant 0 : index
    %c0_8 = arith.constant 0 : index
    %c0_9 = arith.constant 0 : index
    %16 = vector.load %arg6[%c0_7, %c0_8, %c0_9] : memref<1x32x128xbf16, #tpu.memory_space<vmem>>, vector<1x32x128xbf16>
    tpu.vector_store %arg6[%c0_7, %c0_8, %c0_9], %15 {strides = array<i32>} : memref<1x32x128xbf16, #tpu.memory_space<vmem>>, vector<1x32x128xbf16>,
    return
  }
  func.func @transform_0(%arg0: i32, %arg1: i32, %arg2: i32) -> (i32, i32, i32) {
    %c0_i32 = arith.constant 0 : i32
    return %arg0, %arg1, %arg2 : i32, i32, i32
  }
  func.func @transform_1(%arg0: i32, %arg1: i32, %arg2: i32) -> (i32, i32) {
    %c0_i32 = arith.constant 0 : i32
    %c0_i32_0 = arith.constant 0 : i32
    return %c0_i32, %arg2 : i32, i32
  }
  func.func @transform_2(%arg0: i32, %arg1: i32, %arg2: i32) -> (i32, i32) {
    %c0_i32 = arith.constant 0 : i32
    %c0_i32_0 = arith.constant 0 : i32
    return %c0_i32, %arg2 : i32, i32
  }
  func.func @transform_3(%arg0: i32, %arg1: i32, %arg2: i32) -> (i32, i32, i32) {
    %c0_i32 = arith.constant 0 : i32
    return %arg0, %arg1, %arg2 : i32, i32, i32
  }
}

module attributes {stable_mosaic.version = 11 : i64} {
  func.func @_mm_tanh_kernel(%arg0: i32, %arg1: i32, %arg2: i32, %arg3: i32, %arg4: memref<1x128x128xbf16, #tpu.memory_space<vmem>>, %arg5: memref<1x128x128xbf16, #tpu.memory_space<vmem>>, %arg6: memref<1x128x128xbf16, #tpu.memory_space<vmem>>, %arg7: memref<128x128xf32, #tpu.memory_space<vmem>>) attributes {dimension_semantics = [#tpu.dimension_semantics<parallel>, #tpu.dimension_semantics<parallel>, #tpu.dimension_semantics<parallel>, #tpu.dimension_semantics<arbitrary>], iteration_bounds = array<i64: 4, 1, 1, 1>, scalar_prefetch = 0 : i64, scratch_operands = 1 : i64, tpu.core_type = #tpu.core_type<tc>, window_params = [{transform_indices = @transform_0, window_bounds = array<i64: 1, 128, 128>}, {transform_indices = @transform_1, window_bounds = array<i64: 1, 128, 128>}, {transform_indices = @transform_2, window_bounds = array<i64: 1, 128, 128>}]} {
    %c0_i32 = arith.constant 0 : i32
    %0 = arith.cmpi eq, %arg3, %c0_i32 : i32
    %1 = arith.extui %0 : i1 to i32
    %c0_i32_0 = arith.constant 0 : i32
    %2 = arith.cmpi ne, %1, %c0_i32_0 : i32
    scf.if %2 {
      %cst_11 = arith.constant 0.000000e+00 : f32
      %17 = vector.broadcast %cst_11 : f32 to vector<128x128xf32>
      %c0_12 = arith.constant 0 : index
      %c0_13 = arith.constant 0 : index
      %18 = vector.load %arg7[%c0_12, %c0_13] : memref<128x128xf32, #tpu.memory_space<vmem>>, vector<128x128xf32>
      tpu.vector_store %arg7[%c0_12, %c0_13], %17 {strides = array<i32>} : memref<128x128xf32, #tpu.memory_space<vmem>>, vector<128x128xf32>,
    } else {
    }
    %c128_i32 = arith.constant 128 : i32
    %3 = arith.muli %arg3, %c128_i32 : i32
    %4 = tpu.assume_multiple %3, 128 : i32
    %c0 = arith.constant 0 : index
    %5 = arith.index_cast %4 : i32 to index
    %c0_1 = arith.constant 0 : index
    %6 = vector.load %arg5[%c0, %5, %c0_1] : memref<1x128x128xbf16, #tpu.memory_space<vmem>>, vector<1x128x128xbf16>
    %7 = vector.shape_cast %6 : vector<1x128x128xbf16> to vector<128x128xbf16>
    %c0_2 = arith.constant 0 : index
    %c0_3 = arith.constant 0 : index
    %8 = vector.load %arg7[%c0_2, %c0_3] : memref<128x128xf32, #tpu.memory_space<vmem>>, vector<128x128xf32>
    %c0_4 = arith.constant 0 : index
    %c0_5 = arith.constant 0 : index
    %c0_6 = arith.constant 0 : index
    %9 = vector.load %arg4[%c0_4, %c0_5, %c0_6] : memref<1x128x128xbf16, #tpu.memory_space<vmem>>, vector<1x128x128xbf16>
    %10 = vector.shape_cast %9 : vector<1x128x128xbf16> to vector<128x128xbf16>
    %cst = arith.constant dense<0.000000e+00> : vector<128x128xf32>
    %11 = tpu.matmul %10, %7, %cst {dimension_numbers = #tpu.dot_dimension_numbers<[1], [0], [0], [1], [0, 0, 1, 1], [], []>} : vector<128x128xbf16>, vector<128x128xbf16>, vector<128x128xf32> -> vector<128x128xf32>
    %12 = arith.addf %8, %11 : vector<128x128xf32>
    %c0_7 = arith.constant 0 : index
    %c0_8 = arith.constant 0 : index
    %13 = vector.load %arg7[%c0_7, %c0_8] : memref<128x128xf32, #tpu.memory_space<vmem>>, vector<128x128xf32>
    tpu.vector_store %arg7[%c0_7, %c0_8], %12 {strides = array<i32>} : memref<128x128xf32, #tpu.memory_space<vmem>>, vector<128x128xf32>,
    %c0_i32_9 = arith.constant 0 : i32
    %14 = arith.cmpi eq, %arg3, %c0_i32_9 : i32
    %15 = arith.extui %14 : i1 to i32
    %c0_i32_10 = arith.constant 0 : i32
    %16 = arith.cmpi ne, %15, %c0_i32_10 : i32
    scf.if %16 {
      %c0_11 = arith.constant 0 : index
      %c0_12 = arith.constant 0 : index
      %17 = vector.load %arg7[%c0_11, %c0_12] : memref<128x128xf32, #tpu.memory_space<vmem>>, vector<128x128xf32>
      %18 = math.tanh %17 : vector<128x128xf32>
      %19 = arith.truncf %18 : vector<128x128xf32> to vector<128x128xbf16>
      %20 = vector.shape_cast %19 : vector<128x128xbf16> to vector<1x128x128xbf16>
      %c0_13 = arith.constant 0 : index
      %c0_14 = arith.constant 0 : index
      %c0_15 = arith.constant 0 : index
      %21 = vector.load %arg6[%c0_13, %c0_14, %c0_15] : memref<1x128x128xbf16, #tpu.memory_space<vmem>>, vector<1x128x128xbf16>
      tpu.vector_store %arg6[%c0_13, %c0_14, %c0_15], %20 {strides = array<i32>} : memref<1x128x128xbf16, #tpu.memory_space<vmem>>, vector<1x128x128xbf16>,
    } else {
    }
    return
  }
  func.func @transform_0(%arg0: i32, %arg1: i32, %arg2: i32, %arg3: i32) -> (i32, i32, i32) {
    %c0_i32 = arith.constant 0 : i32
    return %arg0, %arg2, %arg3 : i32, i32, i32
  }
  func.func @transform_1(%arg0: i32, %arg1: i32, %arg2: i32, %arg3: i32) -> (i32, i32, i32) {
    %c0_i32 = arith.constant 0 : i32
    %c0_i32_0 = arith.constant 0 : i32
    return %arg0, %c0_i32, %arg1 : i32, i32, i32
  }
  func.func @transform_2(%arg0: i32, %arg1: i32, %arg2: i32, %arg3: i32) -> (i32, i32, i32) {
    %c0_i32 = arith.constant 0 : i32
    return %arg0, %arg2, %arg1 : i32, i32, i32
  }
}

</mosaic_0001>

<bundles_post_ra>
// kernel: squeeze.1
= control target key start
LH: loop header
LB: loop body
LE: loop exit
PB: predicated region body
PF: predicated region fallthrough
CT: control target
= control target key end

     0   :  { %s623_s8 = smov 122   ;;  %s624_s9 = smov 124   ;;  %vm20_vm0 = vcmask 15360   ;;  %v653_v42 = vmov 0.0   ;;  %s859_s0 = inlined_call_operand.vmem [shape: bf16[1,2,64], index: 0, kind: input, shape index: {}]   ;;  %s860_s1 = inlined_call_operand.vmem [shape: bf16[2,16,2,2], index: 1, kind: output, shape index: {}]  }
   0x1   :  { %v15_v0 = vld [vmem:[%s859_s0] sm:$0x1]  ;;  %s622_s0 = smov 126   ;;  %s625_s10 = smov 120  }
   0x2   :  { %v16_v1 = vunpack.c.l.bf16 %v15_v0  ;;  %s626_s11 = smov 118   ;;  %s627_s12 = smov 116  }
   0x3   :  { %s628_s13 = smov 114   ;;  %s629_s14 = smov 112  }
   0x4   :  { %18 = vst [vmem:[#allocation1] sm:$0x3] %v16_v1  ;;  %s630_s15 = smov 110   ;;  %s631_s16 = smov 108  }
   0x5   :  { %s632_s17 = smov 106   ;;  %s633_s18 = smov 104  }
   0x6   :  { %s634_s19 = smov 102   ;;  %s635_s20 = smov 100  }
   0x7   :  { %s636_s21 = smov 98   ;;  %s637_s22 = smov 96  }
   0x8   :  { %s638_s23 = smov 94   ;;  %s639_s24 = smov 92  }
   0x9   :  { %s640_s25 = smov 90   ;;  %s641_s26 = smov 88  }
   0xa   :  { %s642_s27 = smov 86   ;;  %s643_s28 = smov 84  }
   0xb   :  { %v24_v2 = vld [vmem:[#allocation1] sm:$0x3]   ;;  %s644_s29 = smov 82   ;;  %s645_s30 = smov 80  }
   0xc   :  { %v40_v3 = vld [vmem:[#allocation1] sm:$0x3]   ;;  %25 = vrot.lane.b32.xlu0 %v24_v2, %s622_s0  ;;  %s646_s2 = smov 78   ;;  %s647_s3 = smov 76  }
   0xd   :  { %41 = vrot.lane.b32.xlu1 %v40_v3, %s623_s8  ;;  %v32_v4 = vld [vmem:[#allocation1] sm:$0x3]   ;;  %s648_s4 = smov 74   ;;  %s649_s5 = smov 72  }
   0xe   :  { %v48_v5 = vld [vmem:[#allocation1] sm:$0x3]   ;;  %s650_s6 = smov 70   ;;  %s651_s7 = smov 68  }
   0xf   :  { %v56_v6 = vld [vmem:[#allocation1] sm:$0x3]   ;;  %s652_s0 = smov 66  }
  0x10   :  { %33 = vrot.lane.b32.xlu0 %v32_v4, %s624_s9  ;;  %v64_v7 = vld [vmem:[#allocation1] sm:$0x3]  }
  0x11   :  { %49 = vrot.lane.b32.xlu1 %v48_v5, %s625_s10  ;;  %v72_v8 = vld [vmem:[#allocation1] sm:$0x3]  }
  0x12   :  { %v80_v9 = vld [vmem:[#allocation1] sm:$0x3]  }
  0x13   :  { %v19_v10 = vld [vmem:[#allocation1] sm:$0x3]  }
  0x14   :  { %57 = vrot.lane.b32.xlu0 %v56_v6, %s626_s11  ;;  %21 = vst.msk [vmem:[#allocation0] sm:$0x1] %vm20_vm0, %v19_v10   ;;  %23 = vst.msk [vmem:[#allocation0 + $0x7f] sm:$0x2] %vm20_vm0, %v19_v10   ;;  %v88_v11 = vld [vmem:[#allocation1] sm:$0x3]  }
  0x15   :  { %65 = vrot.lane.b32.xlu1 %v64_v7, %s627_s12  ;;  %v96_v12 = vld [vmem:[#allocation1] sm:$0x3]  }
  0x16   :  { %v104_v13 = vld [vmem:[#allocation1] sm:$0x3]  }
  0x17   :  { %v112_v14 = vld [vmem:[#allocation1] sm:$0x3]  }
  0x18   :  { %73 = vrot.lane.b32.xlu0 %v72_v8, %s628_s13  ;;  %v120_v15 = vld [vmem:[#allocation1] sm:$0x3]  }
  0x19   :  { %81 = vrot.lane.b32.xlu1 %v80_v9, %s629_s14  ;;  %v128_v16 = vld [vmem:[#allocation1] sm:$0x3]  }
  0x1a   :  { %v136_v17 = vld [vmem:[#allocation1] sm:$0x3]  }
  0x1b   :  { %v144_v18 = vld [vmem:[#allocation1] sm:$0x3]  }
  0x1c   :  { %89 = vrot.lane.b32.xlu0 %v88_v11, %s630_s15  ;;  %v152_v19 = vld [vmem:[#allocation1] sm:$0x3]  }
  0x1d   :  { %97 = vrot.lane.b32.xlu1 %v96_v12, %s631_s16  ;;  %v160_v20 = vld [vmem:[#allocation1] sm:$0x3]  }
  0x1e   :  { %v168_v21 = vld [vmem:[#allocation1] sm:$0x3]  }
  0x1f   :  { %v176_v22 = vld [vmem:[#allocation1] sm:$0x3]  }
  0x20   :  { %105 = vrot.lane.b32.xlu0 %v104_v13, %s632_s17  ;;  %v184_v23 = vld [vmem:[#allocation1] sm:$0x3]  }
  0x21   :  { %113 = vrot.lane.b32.xlu1 %v112_v14, %s633_s18  ;;  %v192_v24 = vld [vmem:[#allocation1] sm:$0x3]  }
  0x22   :  { %v200_v25 = vld [vmem:[#allocation1] sm:$0x3]  }
  0x23   :  { %v208_v26 = vld [vmem:[#allocation1] sm:$0x3]  }
  0x24   :  { %121 = vrot.lane.b32.xlu0 %v120_v15, %s634_s19  ;;  %v216_v27 = vld [vmem:[#allocation1] sm:$0x3]  }
  0x25   :  { %129 = vrot.lane.b32.xlu1 %v128_v16, %s635_s20  ;;  %v224_v28 = vld [vmem:[#allocation1] sm:$0x3]  }
  0x26   :  { %v232_v29 = vld [vmem:[#allocation1] sm:$0x3]  }
  0x27   :  { %v240_v30 = vld [vmem:[#allocation1] sm:$0x3]  }
  0x28   :  { %137 = vrot.lane.b32.xlu0 %v136_v17, %s636_s21  ;;  %v248_v31 = vld [vmem:[#allocation1] sm:$0x3]  }
  0x29   :  { %145 = vrot.lane.b32.xlu1 %v144_v18, %s637_s22  ;;  %v256_v32 = vld [vmem:[#allocation1] sm:$0x3]  }
  0x2a   :  { %v264_v33 = vld [vmem:[#allocation1] sm:$0x3]  }
  0x2c   :  { %153 = vrot.lane.b32.xlu0 %v152_v19, %s638_s23 }
  0x2d   :  { %161 = vrot.lane.b32.xlu1 %v160_v20, %s639_s24 }
  0x30   :  { %169 = vrot.lane.b32.xlu0 %v168_v21, %s640_s25 }
  0x31   :  { %177 = vrot.lane.b32.xlu1 %v176_v22, %s641_s26 }
  0x34   :  { %185 = vrot.lane.b32.xlu0 %v184_v23, %s642_s27 }
  0x35   :  { %193 = vrot.lane.b32.xlu1 %v192_v24, %s643_s28 }
  0x38   :  { %201 = vrot.lane.b32.xlu0 %v200_v25, %s644_s29 }
  0x39   :  { %209 = vrot.lane.b32.xlu1 %v208_v26, %s645_s30 }
  0x3c   :  { %217 = vrot.lane.b32.xlu0 %v216_v27, %s646_s2 }
  0x3d   :  { %225 = vrot.lane.b32.xlu1 %v224_v28, %s647_s3 }
  0x40   :  { %233 = vrot.lane.b32.xlu0 %v232_v29, %s648_s4 }
  0x41   :  { %241 = vrot.lane.b32.xlu1 %v240_v30, %s649_s5 }
  0x44   :  { %249 = vrot.lane.b32.xlu0 %v248_v31, %s650_s6 }
  0x45   :  { %257 = vrot.lane.b32.xlu1 %v256_v32, %s651_s7 }
  0x48   :  { %265 = vrot.lane.b32.xlu0 %v264_v33, %s652_s0 }
  0x7e   :  { %v26_v34 = vpop.permute.xlu0 %25  }
  0x7f   :  { %v42_v35 = vpop.permute.xlu1 %41   ;;  %29 = vst.msk [vmem:[#allocation0 + $0x1] sm:$0x1] %vm20_vm0, %v26_v34   ;;  %31 = vst.msk [vmem:[#allocation0 + $0x80] sm:$0x2] %vm20_vm0, %v26_v34  }
  0x80   :  { %45 = vst.msk [vmem:[#allocation0 + $0x9] sm:$0x1] %vm20_vm0, %v42_v35   ;;  %47 = vst.msk [vmem:[#allocation0 + $0x88] sm:$0x2] %vm20_vm0, %v42_v35  }
  0x82   :  { %v34_v36 = vpop.permute.xlu0 %33  }
  0x83   :  { %v50_v37 = vpop.permute.xlu1 %49   ;;  %37 = vst.msk [vmem:[#allocation0 + $0x8] sm:$0x1] %vm20_vm0, %v34_v36   ;;  %39 = vst.msk [vmem:[#allocation0 + $0x87] sm:$0x2] %vm20_vm0, %v34_v36  }
  0x84   :  { %53 = vst.msk [vmem:[#allocation0 + $0x10] sm:$0x1] %vm20_vm0, %v50_v37   ;;  %55 = vst.msk [vmem:[#allocation0 + $0x8f] sm:$0x2] %vm20_vm0, %v50_v37  }
  0x86   :  { %v277_v38 = vld [vmem:[#allocation0] sm:$0x3]  ;;  %v58_v40 = vpop.permute.xlu0 %57  }
  0x87   :  { %v402_v39 = vld [vmem:[#allocation0 + $0x80] sm:$0x3]  ;;  %v66_v41 = vpop.permute.xlu1 %65   ;;  %v278_v43 = vpack.c.bf16 %v653_v42, %v277_v38  ;;  %61 = vst.msk [vmem:[#allocation0 + $0x11] sm:$0x1] %vm20_vm0, %v58_v40   ;;  %63 = vst.msk [vmem:[#allocation0 + $0x90] sm:$0x2] %vm20_vm0, %v58_v40  }
  0x88   :  { %v403_v44 = vpack.c.bf16 %v653_v42, %v402_v39  ;;  %69 = vst.msk [vmem:[#allocation0 + $0x18] sm:$0x1] %vm20_vm0, %v66_v41   ;;  %71 = vst.msk [vmem:[#allocation0 + $0x97] sm:$0x2] %vm20_vm0, %v66_v41  }
  0x89   :  { %281 = vst [vmem:[%s860_s1] sm:$0x1] %v278_v43 }
  0x8a   :  { %574 = vst [vmem:[%s860_s1 + $0x10] sm:$0x1] %v403_v44  ;;  %v283_v45 = vld [vmem:[#allocation0 + $0x8] sm:$0x3]  ;;  %v74_v47 = vpop.permute.xlu0 %73  }
  0x8b   :  { %v410_v46 = vld [vmem:[#allocation0 + $0x88] sm:$0x3]  ;;  %v82_v48 = vpop.permute.xlu1 %81   ;;  %v284_v49 = vpack.c.bf16 %v653_v42, %v283_v45  ;;  %77 = vst.msk [vmem:[#allocation0 + $0x19] sm:$0x1] %vm20_vm0, %v74_v47   ;;  %79 = vst.msk [vmem:[#allocation0 + $0x98] sm:$0x2] %vm20_vm0, %v74_v47  }
  0x8c   :  { %v411_v50 = vpack.c.bf16 %v653_v42, %v410_v46  ;;  %85 = vst.msk [vmem:[#allocation0 + $0x20] sm:$0x1] %vm20_vm0, %v82_v48   ;;  %87 = vst.msk [vmem:[#allocation0 + $0x9f] sm:$0x2] %vm20_vm0, %v82_v48  }
  0x8d   :  { %559 = vst [vmem:[%s860_s1 + $0x1] sm:$0x1] %v284_v49 }
  0x8e   :  { %575 = vst [vmem:[%s860_s1 + $0x11] sm:$0x1] %v411_v50  ;;  %v290_v51 = vld [vmem:[#allocation0 + $0x10] sm:$0x3]  ;;  %v90_v53 = vpop.permute.xlu0 %89  }
  0x8f   :  { %v418_v52 = vld [vmem:[#allocation0 + $0x90] sm:$0x3]  ;;  %v98_v54 = vpop.permute.xlu1 %97   ;;  %v291_v55 = vpack.c.bf16 %v653_v42, %v290_v51  ;;  %93 = vst.msk [vmem:[#allocation0 + $0x21] sm:$0x1] %vm20_vm0, %v90_v53   ;;  %95 = vst.msk [vmem:[#allocation0 + $0xa0] sm:$0x2] %vm20_vm0, %v90_v53  }
  0x90   :  { %v419_v56 = vpack.c.bf16 %v653_v42, %v418_v52  ;;  %101 = vst.msk [vmem:[#allocation0 + $0x28] sm:$0x1] %vm20_vm0, %v98_v54   ;;  %103 = vst.msk [vmem:[#allocation0 + $0xa7] sm:$0x2] %vm20_vm0, %v98_v54  }
  0x91   :  { %560 = vst [vmem:[%s860_s1 + $0x2] sm:$0x1] %v291_v55 }
  0x92   :  { %576 = vst [vmem:[%s860_s1 + $0x12] sm:$0x1] %v419_v56  ;;  %v298_v57 = vld [vmem:[#allocation0 + $0x18] sm:$0x3]  ;;  %v106_v59 = vpop.permute.xlu0 %105  }
  0x93   :  { %v426_v58 = vld [vmem:[#allocation0 + $0x98] sm:$0x3]  ;;  %v114_v60 = vpop.permute.xlu1 %113   ;;  %v299_v61 = vpack.c.bf16 %v653_v42, %v298_v57  ;;  %109 = vst.msk [vmem:[#allocation0 + $0x29] sm:$0x1] %vm20_vm0, %v106_v59   ;;  %111 = vst.msk [vmem:[#allocation0 + $0xa8] sm:$0x2] %vm20_vm0, %v106_v59  }
  0x94   :  { %v427_v62 = vpack.c.bf16 %v653_v42, %v426_v58  ;;  %117 = vst.msk [vmem:[#allocation0 + $0x30] sm:$0x1] %vm20_vm0, %v114_v60   ;;  %119 = vst.msk [vmem:[#allocation0 + $0xaf] sm:$0x2] %vm20_vm0, %v114_v60  }
  0x95   :  { %561 = vst [vmem:[%s860_s1 + $0x3] sm:$0x1] %v299_v61 }
  0x96   :  { %577 = vst [vmem:[%s860_s1 + $0x13] sm:$0x1] %v427_v62  ;;  %v306_v63 = vld [vmem:[#allocation0 + $0x20] sm:$0x3]  ;;  %v122_v1 = vpop.permute.xlu0 %121  }
  0x97   :  { %v434_v0 = vld [vmem:[#allocation0 + $0xa0] sm:$0x3]  ;;  %v130_v2 = vpop.permute.xlu1 %129   ;;  %v307_v3 = vpack.c.bf16 %v653_v42, %v306_v63  ;;  %125 = vst.msk [vmem:[#allocation0 + $0x31] sm:$0x1] %vm20_vm0, %v122_v1   ;;  %127 = vst.msk [vmem:[#allocation0 + $0xb0] sm:$0x2] %vm20_vm0, %v122_v1  }
  0x98   :  { %v435_v4 = vpack.c.bf16 %v653_v42, %v434_v0  ;;  %133 = vst.msk [vmem:[#allocation0 + $0x38] sm:$0x1] %vm20_vm0, %v130_v2   ;;  %135 = vst.msk [vmem:[#allocation0 + $0xb7] sm:$0x2] %vm20_vm0, %v130_v2  }
  0x99   :  { %562 = vst [vmem:[%s860_s1 + $0x4] sm:$0x1] %v307_v3 }
  0x9a   :  { %578 = vst [vmem:[%s860_s1 + $0x14] sm:$0x1] %v435_v4  ;;  %v314_v5 = vld [vmem:[#allocation0 + $0x28] sm:$0x3]  ;;  %v138_v7 = vpop.permute.xlu0 %137  }
  0x9b   :  { %v442_v6 = vld [vmem:[#allocation0 + $0xa8] sm:$0x3]  ;;  %v146_v8 = vpop.permute.xlu1 %145   ;;  %v315_v9 = vpack.c.bf16 %v653_v42, %v314_v5  ;;  %141 = vst.msk [vmem:[#allocation0 + $0x39] sm:$0x1] %vm20_vm0, %v138_v7   ;;  %143 = vst.msk [vmem:[#allocation0 + $0xb8] sm:$0x2] %vm20_vm0, %v138_v7  }
  0x9c   :  { %v443_v10 = vpack.c.bf16 %v653_v42, %v442_v6  ;;  %149 = vst.msk [vmem:[#allocation0 + $0x40] sm:$0x1] %vm20_vm0, %v146_v8   ;;  %151 = vst.msk [vmem:[#allocation0 + $0xbf] sm:$0x2] %vm20_vm0, %v146_v8  }
  0x9d   :  { %563 = vst [vmem:[%s860_s1 + $0x5] sm:$0x1] %v315_v9 }
  0x9e   :  { %579 = vst [vmem:[%s860_s1 + $0x15] sm:$0x1] %v443_v10  ;;  %v322_v11 = vld [vmem:[#allocation0 + $0x30] sm:$0x3]  ;;  %v154_v13 = vpop.permute.xlu0 %153  }
  0x9f   :  { %v450_v12 = vld [vmem:[#allocation0 + $0xb0] sm:$0x3]  ;;  %v162_v14 = vpop.permute.xlu1 %161   ;;  %v323_v15 = vpack.c.bf16 %v653_v42, %v322_v11  ;;  %157 = vst.msk [vmem:[#allocation0 + $0x41] sm:$0x1] %vm20_vm0, %v154_v13   ;;  %159 = vst.msk [vmem:[#allocation0 + $0xc0] sm:$0x2] %vm20_vm0, %v154_v13  }
  0xa0   :  { %v451_v16 = vpack.c.bf16 %v653_v42, %v450_v12  ;;  %165 = vst.msk [vmem:[#allocation0 + $0x48] sm:$0x1] %vm20_vm0, %v162_v14   ;;  %167 = vst.msk [vmem:[#allocation0 + $0xc7] sm:$0x2] %vm20_vm0, %v162_v14  }
  0xa1   :  { %564 = vst [vmem:[%s860_s1 + $0x6] sm:$0x1] %v323_v15 }
  0xa2   :  { %580 = vst [vmem:[%s860_s1 + $0x16] sm:$0x1] %v451_v16  ;;  %v330_v17 = vld [vmem:[#allocation0 + $0x38] sm:$0x3]  ;;  %v170_v19 = vpop.permute.xlu0 %169  }
  0xa3   :  { %v458_v18 = vld [vmem:[#allocation0 + $0xb8] sm:$0x3]  ;;  %v178_v20 = vpop.permute.xlu1 %177   ;;  %v331_v21 = vpack.c.bf16 %v653_v42, %v330_v17  ;;  %173 = vst.msk [vmem:[#allocation0 + $0x49] sm:$0x1] %vm20_vm0, %v170_v19   ;;  %175 = vst.msk [vmem:[#allocation0 + $0xc8] sm:$0x2] %vm20_vm0, %v170_v19  }
  0xa4   :  { %v459_v22 = vpack.c.bf16 %v653_v42, %v458_v18  ;;  %181 = vst.msk [vmem:[#allocation0 + $0x50] sm:$0x1] %vm20_vm0, %v178_v20   ;;  %183 = vst.msk [vmem:[#allocation0 + $0xcf] sm:$0x2] %vm20_vm0, %v178_v20  }
  0xa5   :  { %565 = vst [vmem:[%s860_s1 + $0x7] sm:$0x1] %v331_v21 }
  0xa6   :  { %581 = vst [vmem:[%s860_s1 + $0x17] sm:$0x1] %v459_v22  ;;  %v338_v23 = vld [vmem:[#allocation0 + $0x40] sm:$0x3]  ;;  %v186_v25 = vpop.permute.xlu0 %185  }
  0xa7   :  { %v466_v24 = vld [vmem:[#allocation0 + $0xc0] sm:$0x3]  ;;  %v194_v26 = vpop.permute.xlu1 %193   ;;  %v339_v27 = vpack.c.bf16 %v653_v42, %v338_v23  ;;  %189 = vst.msk [vmem:[#allocation0 + $0x51] sm:$0x1] %vm20_vm0, %v186_v25   ;;  %191 = vst.msk [vmem:[#allocation0 + $0xd0] sm:$0x2] %vm20_vm0, %v186_v25  }
  0xa8   :  { %v467_v28 = vpack.c.bf16 %v653_v42, %v466_v24  ;;  %197 = vst.msk [vmem:[#allocation0 + $0x58] sm:$0x1] %vm20_vm0, %v194_v26   ;;  %199 = vst.msk [vmem:[#allocation0 + $0xd7] sm:$0x2] %vm20_vm0, %v194_v26  }
  0xa9   :  { %566 = vst [vmem:[%s860_s1 + $0x8] sm:$0x1] %v339_v27 }
  0xaa   :  { %582 = vst [vmem:[%s860_s1 + $0x18] sm:$0x1] %v467_v28  ;;  %v346_v29 = vld [vmem:[#allocation0 + $0x48] sm:$0x3]  ;;  %v202_v31 = vpop.permute.xlu0 %201  }
  0xab   :  { %v474_v30 = vld [vmem:[#allocation0 + $0xc8] sm:$0x3]  ;;  %v210_v32 = vpop.permute.xlu1 %209   ;;  %v347_v33 = vpack.c.bf16 %v653_v42, %v346_v29  ;;  %205 = vst.msk [vmem:[#allocation0 + $0x59] sm:$0x1] %vm20_vm0, %v202_v31   ;;  %207 = vst.msk [vmem:[#allocation0 + $0xd8] sm:$0x2] %vm20_vm0, %v202_v31  }
  0xac   :  { %v475_v34 = vpack.c.bf16 %v653_v42, %v474_v30  ;;  %213 = vst.msk [vmem:[#allocation0 + $0x60] sm:$0x1] %vm20_vm0, %v210_v32   ;;  %215 = vst.msk [vmem:[#allocation0 + $0xdf] sm:$0x2] %vm20_vm0, %v210_v32  }
  0xad   :  { %567 = vst [vmem:[%s860_s1 + $0x9] sm:$0x1] %v347_v33 }
  0xae   :  { %583 = vst [vmem:[%s860_s1 + $0x19] sm:$0x1] %v475_v34  ;;  %v482_v35 = vld [vmem:[#allocation0 + $0xd0] sm:$0x3]  ;;  %v218_v37 = vpop.permute.xlu0 %217  }
  0xaf   :  { %v354_v36 = vld [vmem:[#allocation0 + $0x50] sm:$0x3]  ;;  %v226_v38 = vpop.permute.xlu1 %225   ;;  %v483_v39 = vpack.c.bf16 %v653_v42, %v482_v35  ;;  %221 = vst.msk [vmem:[#allocation0 + $0x61] sm:$0x1] %vm20_vm0, %v218_v37   ;;  %223 = vst.msk [vmem:[#allocation0 + $0xe0] sm:$0x2] %vm20_vm0, %v218_v37  }
  0xb0   :  { %v355_v40 = vpack.c.bf16 %v653_v42, %v354_v36  ;;  %229 = vst.msk [vmem:[#allocation0 + $0x68] sm:$0x1] %vm20_vm0, %v226_v38   ;;  %231 = vst.msk [vmem:[#allocation0 + $0xe7] sm:$0x2] %vm20_vm0, %v226_v38  }
  0xb1   :  { %584 = vst [vmem:[%s860_s1 + $0x1a] sm:$0x1] %v483_v39 }
  0xb2   :  { %568 = vst [vmem:[%s860_s1 + $0xa] sm:$0x1] %v355_v40  ;;  %v362_v41 = vld [vmem:[#allocation0 + $0x58] sm:$0x3]  ;;  %v234_v44 = vpop.permute.xlu0 %233  }
  0xb3   :  { %v490_v43 = vld [vmem:[#allocation0 + $0xd8] sm:$0x3]  ;;  %v242_v45 = vpop.permute.xlu1 %241   ;;  %v363_v46 = vpack.c.bf16 %v653_v42, %v362_v41  ;;  %237 = vst.msk [vmem:[#allocation0 + $0x69] sm:$0x1] %vm20_vm0, %v234_v44   ;;  %239 = vst.msk [vmem:[#allocation0 + $0xe8] sm:$0x2] %vm20_vm0, %v234_v44  }
  0xb4   :  { %v491_v47 = vpack.c.bf16 %v653_v42, %v490_v43  ;;  %245 = vst.msk [vmem:[#allocation0 + $0x70] sm:$0x1] %vm20_vm0, %v242_v45   ;;  %247 = vst.msk [vmem:[#allocation0 + $0xef] sm:$0x2] %vm20_vm0, %v242_v45  }
  0xb5   :  { %569 = vst [vmem:[%s860_s1 + $0xb] sm:$0x1] %v363_v46 }
  0xb6   :  { %585 = vst [vmem:[%s860_s1 + $0x1b] sm:$0x1] %v491_v47  ;;  %v370_v48 = vld [vmem:[#allocation0 + $0x60] sm:$0x3]  ;;  %v250_v50 = vpop.permute.xlu0 %249  }
  0xb7   :  { %v498_v49 = vld [vmem:[#allocation0 + $0xe0] sm:$0x3]  ;;  %v258_v51 = vpop.permute.xlu1 %257   ;;  %v371_v52 = vpack.c.bf16 %v653_v42, %v370_v48  ;;  %253 = vst.msk [vmem:[#allocation0 + $0x71] sm:$0x1] %vm20_vm0, %v250_v50   ;;  %255 = vst.msk [vmem:[#allocation0 + $0xf0] sm:$0x2] %vm20_vm0, %v250_v50  }
  0xb8   :  { %v499_v53 = vpack.c.bf16 %v653_v42, %v498_v49  ;;  %261 = vst.msk [vmem:[#allocation0 + $0x78] sm:$0x1] %vm20_vm0, %v258_v51   ;;  %263 = vst.msk [vmem:[#allocation0 + $0xf7] sm:$0x2] %vm20_vm0, %v258_v51  }
  0xb9   :  { %570 = vst [vmem:[%s860_s1 + $0xc] sm:$0x1] %v371_v52 }
  0xba   :  { %586 = vst [vmem:[%s860_s1 + $0x1c] sm:$0x1] %v499_v53  ;;  %v378_v54 = vld [vmem:[#allocation0 + $0x68] sm:$0x3]  ;;  %v266_v56 = vpop.permute.xlu0 %265  }
  0xbb   :  { %v506_v55 = vld [vmem:[#allocation0 + $0xe8] sm:$0x3]  ;;  %v379_v57 = vpack.c.bf16 %v653_v42, %v378_v54  ;;  %269 = vst.msk [vmem:[#allocation0 + $0x79] sm:$0x1] %vm20_vm0, %v266_v56   ;;  %271 = vst.msk [vmem:[#allocation0 + $0xf8] sm:$0x2] %vm20_vm0, %v266_v56  }
  0xbc   :  { %v507_v58 = vpack.c.bf16 %v653_v42, %v506_v55 }
  0xbd   :  { %571 = vst [vmem:[%s860_s1 + $0xd] sm:$0x1] %v379_v57 }
  0xbe   :  { %587 = vst [vmem:[%s860_s1 + $0x1d] sm:$0x1] %v507_v58  ;;  %v386_v59 = vld [vmem:[#allocation0 + $0x70] sm:$0x3] }
  0xbf   :  { %v514_v60 = vld [vmem:[#allocation0 + $0xf0] sm:$0x3]  ;;  %v387_v61 = vpack.c.bf16 %v653_v42, %v386_v59 }
  0xc0   :  { %v515_v62 = vpack.c.bf16 %v653_v42, %v514_v60 }
  0xc1   :  { %572 = vst [vmem:[%s860_s1 + $0xe] sm:$0x1] %v387_v61 }
  0xc2   :  { %588 = vst [vmem:[%s860_s1 + $0x1e] sm:$0x1] %v515_v62  ;;  %v394_v63 = vld [vmem:[#allocation0 + $0x78] sm:$0x3] }
  0xc3   :  { %v522_v0 = vld [vmem:[#allocation0 + $0xf8] sm:$0x3]  ;;  %v395_v1 = vpack.c.bf16 %v653_v42, %v394_v63 }
  0xc4   :  { %v523_v42 = vpack.c.bf16 %v653_v42, %v522_v0 }
  0xc5   :  { %573 = vst [vmem:[%s860_s1 + $0xf] sm:$0x1] %v395_v1 }
  0xc6   :  { %589 = vst [vmem:[%s860_s1 + $0x1f] sm:$0x1] %v523_v42 }

// kernel: generator_forward.11
= control target key start
LH: loop header
LB: loop body
LE: loop exit
PB: predicated region body
PF: predicated region fallthrough
CT: control target
= control target key end

     0   :  { %v62_v7 = vmov 1966171168   ;;  %v32_v9 = vlaneseq  ;;  %s103_s0 = inlined_call_operand.vmem [shape: f32[1,1,8,128], index: 0, kind: input, shape index: {}]   ;;  %s104_s1 = inlined_call_operand.vmem [shape: f32[1,128], index: 1, kind: input, shape index: {}]   ;;  %s105_s2 = inlined_call_operand.vmem [shape: f32[1,128], index: 2, kind: input, shape index: {}]   ;;  %s106_s3 = inlined_call_operand.vmem [shape: f32[1,128], index: 3, kind: output, shape index: {0}]   ;;  %s107_s4 = inlined_call_operand.vmem [shape: f32[1,128], index: 4, kind: output, shape index: {1}]  }
   0x1   :  { %v16_v0 = vld [vmem:[%s103_s0] sm:$0xff]  ;;  %v30_v8 = vunpack.c.l.s4 %v62_v7 }
   0x2   :  { %v18_v1 = vmul.f32 0.5, %v16_v0  ;;  %v33_v11 = vshrl.u32 %v32_v9, 7  ;;  %v25_v16 = vld [vmem:[%s104_s1] sm:$0x1] }
   0x3   :  { %v31_v10 = vunpack.c.0.s8 %v30_v8  ;;  %v47_v19 = vld [vmem:[%s105_s2] sm:$0x1] }
   0x4   :  { %v19_v2 = vmul.f32 %v18_v1, %v18_v1 }
   0x5   :  { %v34_v12 = vsub.s32 %v31_v10, %v33_v11 }
   0x6   :  { %v21_v3 = vrot.slane %v19_v2, 7 }
   0x8   :  { %v23_v4 = vsub.f32 %v18_v1, %v21_v3 }
   0xa   :  { %v24_v5 = vmax.f32 %v23_v4, 0.0 }
   0xc   :  { %v26_v6 = vadd.f32 1e-05, %v24_v5 }
   0xe   :  { %60 = vrsqrt.f32 %v26_v6 }
  0x1b   :  { %v61_v13 = vpop.eup %60 }
  0x1c   :  { %v35_v14 = vrot.slane %v61_v13, %v34_v12 }
  0x1e   :  { %v36_v15 = vcombine.high %v35_v14, %v35_v14 }
  0x20   :  { %v43_v17 = vrot.slane %v36_v15, %v34_v12 }
  0x22   :  { %v45_v18 = vmul.f32 %v43_v17, %v25_v16 }
  0x24   :  { %46 = vst [vmem:[%s106_s3] sm:$0x1] %v45_v18  ;;  %v48_v20 = vmul.f32 %v45_v18, %v18_v1 }
  0x26   :  { %v49_v21 = vsub.f32 %v47_v19, %v48_v20 }
  0x28   :  { %50 = vst [vmem:[%s107_s4] sm:$0x1] %v49_v21 }

// kernel: generator_forward.10
= control target key start
LH: loop header
LB: loop body
LE: loop exit
PB: predicated region body
PF: predicated region fallthrough
CT: control target
= control target key end

     0   :  { %9 = vsyncpa [#allocation4], 0  ;;  %s255_s12 = smov [#allocation3]   ;;  %s292_s0 = inlined_call_operand.vmem [shape: bf16[1,8,128], index: 0, kind: input, shape index: {}]   ;;  %s293_s1 = inlined_call_operand.hbm [shape: bf16[1,128,128], index: 1, kind: input, shape index: {}]   ;;  %s294_s2 = inlined_call_operand.vmem [shape: bf16[1,8,128], index: 2, kind: output, shape index: {0}]   ;;  %s295_s3 = inlined_call_operand.vmem [shape: f32[1,1,8,128], index: 3, kind: output, shape index: {1}]  }
   0x1   :  { %s17_s13 = sshll.u32 %s255_s12, 4  ;;  %s18_s13 = int_to_ptr.vmem [resolvable:$true] %s17_s13 }
   0x2   :  { %s241_s14 = scalar_lea.vmem %s18_s13, 1024  ;;  %p246_p1 = scmp.lt.s32.totalorder %s18_s13, %s18_s13 }
   0x3   :  { %p242_p0 = scmp.ne.s32.totalorder %s18_s13, %s241_s14  ;;  %p247_p2 = scmp.lt.s32.totalorder %s241_s14, %s241_s14 }
   0x5   :  { %p248_p3 = por %p247_p2, %p246_p1 }
   0x7   :  { %p249_p4 = pnand %p248_p3, %p242_p0 }
   0x9   :  { %252 = shalt.err (!%p249_p4)
}
   0xa   :  { %s256_s15 = smov 64   ;;  %s257_s16 = smov 4  }
   0xb   :  { %23 = dma.hbm_to_vmem [thread:$0]  %s293_s1, 1024, %s18_s13, [#allocation4], %s256_s15, %s256_s15, %s257_s16  }
   0xc   :  { %253 = dma.done.wait [#allocation4], 1024  }
   0xd   :  { %254 = vsyncadd [#allocation4], 4294966272  ;;  %v258_v0 = vmov 0.0   ;;  %vm259_vm0 = vmmov 0   ;;  %v225_v1 = vld [vmem:[#allocation3 + $0x38] sm:$0xff]   ;;  %v226_v2 = vld [vmem:[#allocation3 + $0x30] sm:$0xff]   ;;  %v165_v17 = vlaneseq }
   0xe   :  { %200 = vmatprep.subr.bf16.mxu0 %v258_v0  ;;  %216 = vmatprep.mubr.msk.bf16.mxu0 %vm259_vm0, %v258_v0  ;;  %v227_v3 = vld [vmem:[#allocation3 + $0x28] sm:$0xff]   ;;  %v228_v4 = vld [vmem:[#allocation3 + $0x20] sm:$0xff]   ;;  %v229_v5 = vld [vmem:[#allocation3 + $0x18] sm:$0xff]  }
   0xf   :  { %201 = vmatpush3.bf16.msra.mxu0 %v225_v1  ;;  %v230_v6 = vld [vmem:[#allocation3 + $0x10] sm:$0xff]   ;;  %v231_v7 = vld [vmem:[#allocation3 + $0x8] sm:$0xff]   ;;  %v232_v8 = vld [vmem:[#allocation3] sm:$0xff]   ;;  %v166_v24 = vshrl.u32 %v165_v17, 7 }
  0x10   :  { %202 = vmatprep.subr.bf16.mxu0 %v258_v0  ;;  %v55_v9 = vld [vmem:[%s292_s0] sm:$0xf] }
  0x11   :  { %vm168_vm1 = vcmp.eq.s32.totalorder %v166_v24, 1  ;;  %vm167_vm2 = vcmp.eq.s32.totalorder %v166_v24, 0 }
  0x13   :  { %203 = vmatpush3.bf16.msra.mxu0 %v226_v2 }
  0x14   :  { %204 = vmatprep.subr.bf16.mxu0 %v258_v0 }
  0x17   :  { %205 = vmatpush3.bf16.msra.mxu0 %v227_v3 }
  0x18   :  { %206 = vmatprep.subr.bf16.mxu0 %v258_v0 }
  0x1b   :  { %207 = vmatpush3.bf16.msra.mxu0 %v228_v4 }
  0x1c   :  { %208 = vmatprep.subr.bf16.mxu0 %v258_v0 }
  0x1f   :  { %209 = vmatpush3.bf16.msra.mxu0 %v229_v5 }
  0x20   :  { %210 = vmatprep.subr.bf16.mxu0 %v258_v0 }
  0x23   :  { %211 = vmatpush3.bf16.msra.mxu0 %v230_v6 }
  0x24   :  { %212 = vmatprep.subr.bf16.mxu0 %v258_v0 }
  0x27   :  { %213 = vmatpush3.bf16.msra.mxu0 %v231_v7 }
  0x28   :  { %214 = vmatprep.subr.bf16.mxu0 %v258_v0 }
  0x2b   :  { %215 = vmatpush3.bf16.msra.mxu0 %v232_v8 }
  0x2e   :  { %217 = vmatmul.mubr.bf16.vlgmr.msra.gmra.mxu0 %v55_v9 }
  0xee   :  { %v138_v10 = vpop.f32.mrf.mxu0 }
  0xef   :  { %v150_v11 = vpack.c.bf16 %v138_v10, %v138_v10  ;;  %v152_v12 = vrot.slane %v138_v10, 4  ;;  %v158_v13 = vmul.f32 %v138_v10, %v138_v10 }
  0xf0   :  { %v218_v14 = vpop.f32.mrf.mxu0 }
  0xf1   :  { %151 = vst [vmem:[%s294_s2] sm:$0xf] %v150_v11  ;;  %v153_v15 = vadd.f32 %v152_v12, %v138_v10  ;;  %v159_v16 = vrot.slane %v158_v13, 4 }
  0xf2   :  { %v141_v18 = vpop.f32.mrf.mxu0 }
  0xf3   :  { %v154_v19 = vrot.slane %v153_v15, 2  ;;  %v160_v20 = vadd.f32 %v159_v16, %v158_v13 }
  0xf4   :  { %v219_v21 = vpop.f32.mrf.mxu0 }
  0xf5   :  { %v155_v22 = vadd.f32 %v154_v19, %v153_v15  ;;  %v161_v23 = vrot.slane %v160_v20, 2 }
  0xf7   :  { %v162_v25 = vadd.f32 %v161_v23, %v160_v20  ;;  %v156_v26 = vrot.slane %v155_v22, 1 }
  0xf9   :  { %v163_v27 = vrot.slane %v162_v25, 1  ;;  %v157_v29 = vadd.f32 %v156_v26, %v155_v22 }
  0xfb   :  { %v164_v28 = vadd.f32 %v163_v27, %v162_v25 }
  0xfd   :  { %v169_v30 = vsel %vm168_vm1, %v164_v28, 0.0 }
  0xfe   :  { %v170_v31 = vsel %vm167_vm2, %v157_v29, %v169_v30 }
  0xff   :  { %171 = vst [vmem:[%s295_s3] sm:$0xff] %v170_v31 }
 0x100   :  { %180 = vsyncpa [#allocation4], 1 }

// kernel: generator_forward.12
= control target key start
LH: loop header
LB: loop body
LE: loop exit
PB: predicated region body
PF: predicated region fallthrough
CT: control target
= control target key end

     0   :  { %s75_s0 = inlined_call_operand.vmem [shape: bf16[1,8,128], index: 0, kind: input, shape index: {}]   ;;  %s76_s1 = inlined_call_operand.vmem [shape: f32[1,128], index: 1, kind: input, shape index: {}]   ;;  %s77_s2 = inlined_call_operand.vmem [shape: f32[1,128], index: 2, kind: input, shape index: {}]   ;;  %s78_s3 = inlined_call_operand.vmem [shape: bf16[1,8,128], index: 3, kind: output, shape index: {}]  }
   0x1   :  { %v14_v0 = vld [vmem:[%s75_s0] sm:$0xf] }
   0x2   :  { %v41_v1 = vld [vmem:[%s76_s1] ss:$0 sm:$0xff]  ;;  %v15_v2 = vunpack.c.l.bf16 %v14_v0 }
   0x3   :  { %v42_v3 = vld [vmem:[%s77_s2] ss:$0 sm:$0xff] }
   0x4   :  { %v23_v4 = vmul.f32 %v41_v1, %v15_v2 }
   0x6   :  { %v31_v5 = vadd.f32 %v42_v3, %v23_v4 }
   0x8   :  { %vm32_vm0 = vcmp.ge.f32.partialorder %v31_v5, 0.0  ;;  %v33_v6 = vmul.f32 0.2, %v31_v5 }
   0xa   :  { %v34_v7 = vsel %vm32_vm0, %v31_v5, %v33_v6 }
   0xb   :  { %v35_v8 = vpack.c.bf16 %v34_v7, %v34_v7 }
   0xd   :  { %36 = vst [vmem:[%s78_s3] sm:$0xf] %v35_v8 }

// kernel: generator_forward.14
= control target key start
LH: loop header
LB: loop body
LE: loop exit
PB: predicated region body
PF: predicated region fallthrough
CT: control target
= control target key end

     0   :  { %v67_v13 = vmov 1966171168   ;;  %v37_v15 = vlaneseq  ;;  %s117_s0 = inlined_call_operand.vmem [shape: f32[4,1,8,128], index: 0, kind: input, shape index: {}]   ;;  %s118_s1 = inlined_call_operand.vmem [shape: f32[1,128], index: 1, kind: input, shape index: {}]   ;;  %s119_s2 = inlined_call_operand.vmem [shape: f32[1,128], index: 2, kind: input, shape index: {}]   ;;  %s120_s3 = inlined_call_operand.vmem [shape: f32[1,128], index: 3, kind: output, shape index: {0}]   ;;  %s121_s4 = inlined_call_operand.vmem [shape: f32[1,128], index: 4, kind: output, shape index: {1}]  }
   0x1   :  { %v16_v0 = vld [vmem:[%s117_s0] sm:$0xff]  ;;  %v17_v1 = vld [vmem:[%s117_s0 + $0x8] sm:$0xff]  ;;  %v18_v2 = vld [vmem:[%s117_s0 + $0x10] sm:$0xff]  ;;  %v35_v14 = vunpack.c.l.s4 %v67_v13 }
   0x2   :  { %v20_v3 = vadd.f32 %v17_v1, %v16_v0  ;;  %v19_v4 = vld [vmem:[%s117_s0 + $0x18] sm:$0xff]  ;;  %v38_v17 = vshrl.u32 %v37_v15, 7  ;;  %v30_v22 = vld [vmem:[%s118_s1] sm:$0x1] }
   0x3   :  { %v36_v16 = vunpack.c.0.s8 %v35_v14  ;;  %v52_v25 = vld [vmem:[%s119_s2] sm:$0x1] }
   0x4   :  { %v21_v5 = vadd.f32 %v20_v3, %v18_v2 }
   0x5   :  { %v39_v18 = vsub.s32 %v36_v16, %v38_v17 }
   0x6   :  { %v22_v6 = vadd.f32 %v21_v5, %v19_v4 }
   0x8   :  { %v23_v7 = vmul.f32 0.03125, %v22_v6 }
   0xa   :  { %v24_v8 = vmul.f32 %v23_v7, %v23_v7 }
   0xc   :  { %v26_v9 = vrot.slane %v24_v8, 7 }
   0xe   :  { %v28_v10 = vsub.f32 %v23_v7, %v26_v9 }
  0x10   :  { %v29_v11 = vmax.f32 %v28_v10, 0.0 }
  0x12   :  { %v31_v12 = vadd.f32 1e-05, %v29_v11 }
  0x14   :  { %65 = vrsqrt.f32 %v31_v12 }
  0x21   :  { %v66_v19 = vpop.eup %65 }
  0x22   :  { %v40_v20 = vrot.slane %v66_v19, %v39_v18 }
  0x24   :  { %v41_v21 = vcombine.high %v40_v20, %v40_v20 }
  0x26   :  { %v48_v23 = vrot.slane %v41_v21, %v39_v18 }
  0x28   :  { %v50_v24 = vmul.f32 %v48_v23, %v30_v22 }
  0x2a   :  { %51 = vst [vmem:[%s120_s3] sm:$0x1] %v50_v24  ;;  %v53_v26 = vmul.f32 %v50_v24, %v23_v7 }
  0x2c   :  { %v54_v27 = vsub.f32 %v52_v25, %v53_v26 }
  0x2e   :  { %55 = vst [vmem:[%s121_s4] sm:$0x1] %v54_v27 }

// kernel: generator_forward.13
= control target key start
LH: loop header
LB: loop body
LE: loop exit
PB: predicated region body
PF: predicated region fallthrough
CT: control target
= control target key end

     0   :  { %s727_s12 = smov 0   ;;  %s729_s13 = smov 0   ;;  %s771_s0 = inlined_call_operand.vmem [shape: bf16[4,8,128], index: 0, kind: input, shape index: {}]   ;;  %s772_s1 = inlined_call_operand.vmem [shape: bf16[4,128,128], index: 1, kind: input, shape index: {}]   ;;  %s773_s2 = inlined_call_operand.vmem [shape: bf16[4,8,128], index: 2, kind: output, shape index: {0}]   ;;  %s774_s3 = inlined_call_operand.vmem [shape: f32[4,1,8,128], index: 3, kind: output, shape index: {1}]  }
   0x1   :  { %s731_s14 = smov 0  }
   0x2 LB: > { %s40_s15 = sadd.s32 1, %s699_s13  ;;  %p601_p0 = scmp.ge.s32.totalorder %s703_s14, 1  ;;  %s703_s14 = sphi %s731_s14, %s14_s14   ;;  %s699_s13 = sphi %s729_s13, %s776_s13   ;;  %s695_s12 = sphi %s727_s12, %s775_s12  }
   0x3   : > { %p42_p1 = scmp.ge.s32.totalorder %s40_s15, 4  ;;  %p198_p2 = scmp.lt.s32.totalorder %s703_s14, 5 }
   0x5   : > { %s778_s15 = smov (%p42_p1, %s40_s15), 0  ;;  %p199_p3 = pnand %p601_p0, %p198_p2 }
   0x6   : > { %p250_p4 = scmp.lt.s32.totalorder (!%p199_p3), %s695_s12, 3 }
   0x7   : > { %202 = sbr.rel (%p199_p3) target bundleno = 257 (0x101), region = 28 }
   0xc   : > { %v705_v0 = vmov 0.0   ;;  %vm706_vm0 = vmmov 0   ;;  %s780_s12 = smov (!%p250_p4, %s695_s12), 3  ;;  %v426_v17 = vlaneseq }
   0xd   : > { %627 = vmatprep.subr.bf16.mxu0 %v705_v0  ;;  %643 = vmatprep.mubr.msk.bf16.mxu0 %vm706_vm0, %v705_v0  ;;  %s617_s16 = sshll.u32 %s780_s12, 6  ;;  %s602_s20 = sshll.u32 %s780_s12, 2 }
   0xe   : > { %s267_s19 = scalar_lea.vmem %s772_s1, %s617_s16  ;;  %s259_s23 = scalar_lea.vmem %s771_s0, %s602_s20  ;;  %v427_v24 = vshrl.u32 %v426_v17, 7 }
   0xf   : > { %v673_v1 = vld [vmem:[%s267_s19 + $0x38] sm:$0xff]   ;;  %v674_v2 = vld [vmem:[%s267_s19 + $0x30] sm:$0xff]   ;;  %v675_v3 = vld [vmem:[%s267_s19 + $0x28] sm:$0xff]   ;;  %s277_s26 = scalar_lea.vmem %s773_s2, %s602_s20  ;;  %s606_s27 = sshll.u32 %s780_s12, 3 }
  0x10   : > { %628 = vmatpush3.bf16.msra.mxu0 %v673_v1  ;;  %v676_v4 = vld [vmem:[%s267_s19 + $0x20] sm:$0xff]   ;;  %v677_v5 = vld [vmem:[%s267_s19 + $0x18] sm:$0xff]   ;;  %v678_v6 = vld [vmem:[%s267_s19 + $0x10] sm:$0xff]   ;;  %vm429_vm1 = vcmp.eq.s32.totalorder %v427_v24, 1  ;;  %vm428_vm2 = vcmp.eq.s32.totalorder %v427_v24, 0  ;;  %s287_s30 = scalar_lea.vmem %s774_s3, %s606_s27 }
  0x11   : > { %629 = vmatprep.subr.bf16.mxu0 %v705_v0  ;;  %v679_v7 = vld [vmem:[%s267_s19 + $0x8] sm:$0xff]   ;;  %v680_v8 = vld [vmem:[%s267_s19] sm:$0xff]  }
  0x12   : > { %v316_v9 = vld [vmem:[%s259_s23] sm:$0xf] }
  0x14   : > { %630 = vmatpush3.bf16.msra.mxu0 %v674_v2 }
  0x15   : > { %631 = vmatprep.subr.bf16.mxu0 %v705_v0 }
  0x18   : > { %632 = vmatpush3.bf16.msra.mxu0 %v675_v3 }
  0x19   : > { %633 = vmatprep.subr.bf16.mxu0 %v705_v0 }
  0x1c   : > { %634 = vmatpush3.bf16.msra.mxu0 %v676_v4 }
  0x1d   : > { %635 = vmatprep.subr.bf16.mxu0 %v705_v0 }
  0x20   : > { %636 = vmatpush3.bf16.msra.mxu0 %v677_v5 }
  0x21   : > { %637 = vmatprep.subr.bf16.mxu0 %v705_v0 }
  0x24   : > { %638 = vmatpush3.bf16.msra.mxu0 %v678_v6 }
  0x25   : > { %639 = vmatprep.subr.bf16.mxu0 %v705_v0 }
  0x28   : > { %640 = vmatpush3.bf16.msra.mxu0 %v679_v7 }
  0x29   : > { %641 = vmatprep.subr.bf16.mxu0 %v705_v0 }
  0x2c   : > { %642 = vmatpush3.bf16.msra.mxu0 %v680_v8 }
  0x2f   : > { %644 = vmatmul.mubr.bf16.vlgmr.msra.gmra.mxu0 %v316_v9 }
  0xef   : > { %v399_v10 = vpop.f32.mrf.mxu0 }
  0xf0   : > { %v411_v11 = vpack.c.bf16 %v399_v10, %v399_v10  ;;  %v413_v12 = vrot.slane %v399_v10, 4  ;;  %v419_v13 = vmul.f32 %v399_v10, %v399_v10 }
  0xf1   : > { %v645_v14 = vpop.f32.mrf.mxu0 }
  0xf2   : > { %412 = vst [vmem:[%s277_s26] sm:$0xf] %v411_v11  ;;  %v414_v15 = vadd.f32 %v413_v12, %v399_v10  ;;  %v420_v16 = vrot.slane %v419_v13, 4 }
  0xf3   : > { %v402_v18 = vpop.f32.mrf.mxu0 }
  0xf4   : > { %v415_v19 = vrot.slane %v414_v15, 2  ;;  %v421_v20 = vadd.f32 %v420_v16, %v419_v13 }
  0xf5   : > { %v646_v21 = vpop.f32.mrf.mxu0 }
  0xf6   : > { %v416_v22 = vadd.f32 %v415_v19, %v414_v15  ;;  %v422_v23 = vrot.slane %v421_v20, 2 }
  0xf8   : > { %v423_v25 = vadd.f32 %v422_v23, %v421_v20  ;;  %v417_v26 = vrot.slane %v416_v22, 1 }
  0xfa   : > { %v424_v27 = vrot.slane %v423_v25, 1  ;;  %v418_v29 = vadd.f32 %v417_v26, %v416_v22 }
  0xfc   : > { %v425_v28 = vadd.f32 %v424_v27, %v423_v25 }
  0xfe   : > { %v430_v30 = vsel %vm429_vm1, %v425_v28, 0.0 }
  0xff   : > { %v431_v31 = vsel %vm428_vm2, %v418_v29, %v430_v30 }
 0x100   : > { %432 = vst [vmem:[%s287_s30] sm:$0xff] %v431_v31 }
 0x101 PF: > { %s14_s14 = sadd.s32 1, %s703_s14   ;;  %s775_s12 = smov %s699_s13 }
 0x102   : > { %p11_p5 = scmp.ge.s32.totalorder %s14_s14, 6   ;;  %s776_s13 = smov %s778_s15 }
 0x104   :  { %13 = sbr.rel (!%p11_p5) target bundleno = 2 (0x2), region = 82 }

// kernel: generator_forward.15
= control target key start
LH: loop header
LB: loop body
LE: loop exit
PB: predicated region body
PF: predicated region fallthrough
CT: control target
= control target key end

     0   :  { %s470_s12 = smov 0   ;;  %s472_s13 = smov 0   ;;  %s502_s0 = inlined_call_operand.vmem [shape: bf16[4,8,128], index: 0, kind: input, shape index: {}]   ;;  %s503_s1 = inlined_call_operand.vmem [shape: f32[1,128], index: 1, kind: input, shape index: {}]   ;;  %s504_s2 = inlined_call_operand.vmem [shape: f32[1,128], index: 2, kind: input, shape index: {}]   ;;  %s505_s3 = inlined_call_operand.vmem [shape: bf16[4,8,128], index: 3, kind: output, shape index: {}]  }
   0x1   :  { %s474_s14 = smov 0  }
   0x2 LB: > { %s32_s15 = sadd.s32 1, %s444_s13  ;;  %p395_p0 = scmp.ge.s32.totalorder %s448_s14, 1  ;;  %s448_s14 = sphi %s474_s14, %s13_s14   ;;  %s444_s13 = sphi %s472_s13, %s507_s13   ;;  %s440_s12 = sphi %s470_s12, %s506_s12  }
   0x3   : > { %p34_p1 = scmp.ge.s32.totalorder %s32_s15, 4  ;;  %p185_p2 = scmp.lt.s32.totalorder %s448_s14, 5 }
   0x5   : > { %s509_s15 = smov (%p34_p1, %s32_s15), 0  ;;  %p186_p3 = pnand %p395_p0, %p185_p2 }
   0x6   : > { %p225_p4 = scmp.lt.s32.totalorder (!%p186_p3), %s440_s12, 3 }
   0x7   : > { %189 = sbr.rel (%p186_p3) target bundleno = 28 (0x1c), region = 32 }
   0xc   : > { %s511_s12 = smov (!%p225_p4, %s440_s12), 3  ;;  %v398_v1 = vld [vmem:[%s503_s1] ss:$0 sm:$0xff] }
   0xd   : > { %s396_s16 = sshll.u32 %s511_s12, 2  ;;  %v399_v3 = vld [vmem:[%s504_s2] ss:$0 sm:$0xff] }
   0xe   : > { %s234_s19 = scalar_lea.vmem %s502_s0, %s396_s16  ;;  %s250_s26 = scalar_lea.vmem %s505_s3, %s396_s16 }
   0xf   : > { %v251_v0 = vld [vmem:[%s234_s19] sm:$0xf] }
  0x10   : > { %v252_v2 = vunpack.c.l.bf16 %v251_v0 }
  0x12   : > { %v260_v4 = vmul.f32 %v398_v1, %v252_v2 }
  0x14   : > { %v268_v5 = vadd.f32 %v399_v3, %v260_v4 }
  0x16   : > { %vm269_vm0 = vcmp.ge.f32.partialorder %v268_v5, 0.0  ;;  %v270_v6 = vmul.f32 0.2, %v268_v5 }
  0x18   : > { %v271_v7 = vsel %vm269_vm0, %v268_v5, %v270_v6 }
  0x19   : > { %v272_v8 = vpack.c.bf16 %v271_v7, %v271_v7 }
  0x1b   : > { %273 = vst [vmem:[%s250_s26] sm:$0xf] %v272_v8 }
  0x1c PF: > { %s13_s14 = sadd.s32 1, %s448_s14   ;;  %s506_s12 = smov %s444_s13 }
  0x1d   : > { %p10_p5 = scmp.ge.s32.totalorder %s13_s14, 6   ;;  %s507_s13 = smov %s509_s15 }
  0x1f   :  { %12 = sbr.rel (!%p10_p5) target bundleno = 2 (0x2), region = 68 }

// kernel: generator_forward.16
= control target key start
LH: loop header
LB: loop body
LE: loop exit
PB: predicated region body
PF: predicated region fallthrough
CT: control target
= control target key end

     0   :  { %s843_s12 = smov 0   ;;  %s845_s13 = smov 0   ;;  %s891_s0 = inlined_call_operand.vmem [shape: bf16[4,32,128], index: 0, kind: input, shape index: {}]   ;;  %s892_s1 = inlined_call_operand.vmem [shape: bf16[4,128,128], index: 1, kind: input, shape index: {}]   ;;  %s893_s2 = inlined_call_operand.vmem [shape: bf16[4,32,128], index: 2, kind: output, shape index: {0}]   ;;  %s894_s3 = inlined_call_operand.vmem [shape: f32[4,1,8,128], index: 3, kind: output, shape index: {1}]  }
   0x1   :  { %s847_s14 = smov 0  }
   0x2 LB: > { %s40_s15 = sadd.s32 1, %s817_s13  ;;  %p693_p0 = scmp.ge.s32.totalorder %s821_s14, 1  ;;  %s821_s14 = sphi %s847_s14, %s14_s14   ;;  %s817_s13 = sphi %s845_s13, %s896_s13   ;;  %s813_s12 = sphi %s843_s12, %s895_s12  }
   0x3   : > { %p42_p1 = scmp.ge.s32.totalorder %s40_s15, 4  ;;  %p201_p2 = scmp.lt.s32.totalorder %s821_s14, 5 }
   0x5   : > { %s898_s15 = smov (%p42_p1, %s40_s15), 0  ;;  %p202_p3 = pnand %p693_p0, %p201_p2 }
   0x6   : > { %p258_p4 = scmp.lt.s32.totalorder (!%p202_p3), %s813_s12, 3 }
   0x7   : > { %205 = sbr.rel (%p202_p3) target bundleno = 270 (0x10e), region = 28 }
   0xc   : > { %s900_s12 = smov (!%p258_p4, %s813_s12), 3  ;;  %v505_v29 = vlaneseq }
   0xd   : > { %s718_s16 = sshll.u32 %s900_s12, 6  ;;  %s717_s20 = sshll.u32 %s900_s12, 4 }
   0xe   : > { %s277_s19 = scalar_lea.vmem %s892_s1, %s718_s16  ;;  %s268_s23 = scalar_lea.vmem %s891_s0, %s717_s20  ;;  %v506_v34 = vshrl.u32 %v505_v29, 7 }
   0xf   : > { %v789_v0 = vld [vmem:[%s277_s19 + $0x38] sm:$0xff]   ;;  %v790_v1 = vld [vmem:[%s277_s19 + $0x30] sm:$0xff]   ;;  %v791_v2 = vld [vmem:[%s277_s19 + $0x28] sm:$0xff]   ;;  %s289_s26 = scalar_lea.vmem %s893_s2, %s717_s20  ;;  %s700_s27 = sshll.u32 %s900_s12, 3 }
  0x10   : > { %745 = vmatprep.subr.bf16.mxu0 %v789_v0  ;;  %v792_v3 = vld [vmem:[%s277_s19 + $0x20] sm:$0xff]   ;;  %v793_v5 = vld [vmem:[%s277_s19 + $0x18] sm:$0xff]   ;;  %v794_v6 = vld [vmem:[%s277_s19 + $0x10] sm:$0xff]   ;;  %vm508_vm0 = vcmp.eq.s32.totalorder %v506_v34, 1  ;;  %vm507_vm1 = vcmp.eq.s32.totalorder %v506_v34, 0  ;;  %s300_s30 = scalar_lea.vmem %s894_s3, %s700_s27 }
  0x11   : > { %746 = vmatpush3.bf16.msra.mxu0 %v789_v0  ;;  %v797_v4 = vld [vmem:[%s268_s23] sm:$0xff]   ;;  %v795_v7 = vld [vmem:[%s277_s19 + $0x8] sm:$0xff]  }
  0x12   : > { %747 = vmatprep.subr.bf16.mxu0 %v790_v1  ;;  %761 = vmatprep.mubr.bf16.mxu0 %v797_v4  ;;  %v796_v8 = vld [vmem:[%s277_s19] sm:$0xff]   ;;  %v798_v9 = vld [vmem:[%s268_s23 + $0x8] sm:$0xff]  }
  0x15   : > { %748 = vmatpush3.bf16.msra.mxu0 %v790_v1 }
  0x16   : > { %749 = vmatprep.subr.bf16.mxu0 %v791_v2 }
  0x19   : > { %750 = vmatpush3.bf16.msra.mxu0 %v791_v2 }
  0x1a   : > { %751 = vmatprep.subr.bf16.mxu0 %v792_v3 }
  0x1d   : > { %752 = vmatpush3.bf16.msra.mxu0 %v792_v3 }
  0x1e   : > { %753 = vmatprep.subr.bf16.mxu0 %v793_v5 }
  0x21   : > { %754 = vmatpush3.bf16.msra.mxu0 %v793_v5 }
  0x22   : > { %755 = vmatprep.subr.bf16.mxu0 %v794_v6 }
  0x25   : > { %756 = vmatpush3.bf16.msra.mxu0 %v794_v6 }
  0x26   : > { %757 = vmatprep.subr.bf16.mxu0 %v795_v7 }
  0x29   : > { %758 = vmatpush3.bf16.msra.mxu0 %v795_v7 }
  0x2a   : > { %759 = vmatprep.subr.bf16.mxu0 %v796_v8 }
  0x2d   : > { %760 = vmatpush3.bf16.msra.mxu0 %v796_v8 }
  0x30   : > { %762 = vmatmul.mubr.bf16.vlgmr.msra.gmra.mxu0 %v798_v9 }
  0xf0   : > { %v763_v10 = vpop.f32.mrf.mxu0 }
  0xf1   : > { %v494_v19 = vmul.f32 %v763_v10, %v763_v10 }
  0xf2   : > { %v433_v11 = vpop.f32.mrf.mxu0 }
  0xf3   : > { %v492_v15 = vmul.f32 %v433_v11, %v433_v11 }
  0xf4   : > { %v764_v12 = vpop.f32.mrf.mxu0 }
  0xf5   : > { %v732_v13 = vpack.c.bf16 %v764_v12, %v763_v10  ;;  %v495_v22 = vmul.f32 %v764_v12, %v764_v12 }
  0xf6   : > { %v436_v14 = vpop.f32.mrf.mxu0 }
  0xf7   : > { %v727_v16 = vpack.c.bf16 %v436_v14, %v433_v11  ;;  %734 = vst [vmem:[%s289_s26 + $0x8] sm:$0xff] %v732_v13   ;;  %v483_v17 = vadd.f32 %v436_v14, %v433_v11  ;;  %v493_v18 = vmul.f32 %v436_v14, %v436_v14 }
  0xf9   : > { %728 = vst [vmem:[%s289_s26] sm:$0xff] %v727_v16   ;;  %v484_v20 = vadd.f32 %v763_v10, %v483_v17  ;;  %v496_v21 = vadd.f32 %v493_v18, %v492_v15 }
  0xfb   : > { %v485_v23 = vadd.f32 %v764_v12, %v484_v20  ;;  %v497_v24 = vadd.f32 %v496_v21, %v494_v19 }
  0xfd   : > { %v486_v25 = vrot.slane %v485_v23, 4  ;;  %v498_v26 = vadd.f32 %v497_v24, %v495_v22 }
  0xff   : > { %v487_v27 = vadd.f32 %v486_v25, %v485_v23  ;;  %v499_v28 = vrot.slane %v498_v26, 4 }
 0x101   : > { %v488_v30 = vrot.slane %v487_v27, 2  ;;  %v500_v31 = vadd.f32 %v499_v28, %v498_v26 }
 0x103   : > { %v489_v32 = vadd.f32 %v488_v30, %v487_v27  ;;  %v501_v33 = vrot.slane %v500_v31, 2 }
 0x105   : > { %v502_v35 = vadd.f32 %v501_v33, %v500_v31  ;;  %v490_v36 = vrot.slane %v489_v32, 1 }
 0x107   : > { %v503_v37 = vrot.slane %v502_v35, 1  ;;  %v491_v39 = vadd.f32 %v490_v36, %v489_v32 }
 0x109   : > { %v504_v38 = vadd.f32 %v503_v37, %v502_v35 }
 0x10b   : > { %v509_v40 = vsel %vm508_vm0, %v504_v38, 0.0 }
 0x10c   : > { %v510_v41 = vsel %vm507_vm1, %v491_v39, %v509_v40 }
 0x10d   : > { %511 = vst [vmem:[%s300_s30] sm:$0xff] %v510_v41 }
 0x10e PF: > { %s14_s14 = sadd.s32 1, %s821_s14   ;;  %s895_s12 = smov %s817_s13 }
 0x10f   : > { %p11_p5 = scmp.ge.s32.totalorder %s14_s14, 6   ;;  %s896_s13 = smov %s898_s15 }
 0x111   :  { %13 = sbr.rel (!%p11_p5) target bundleno = 2 (0x2), region = 82 }

// kernel: generator_forward.17
= control target key start
LH: loop header
LB: loop body
LE: loop exit
PB: predicated region body
PF: predicated region fallthrough
CT: control target
= control target key end

     0   :  { %v67_v13 = vmov 1966171168   ;;  %v37_v15 = vlaneseq  ;;  %s117_s0 = inlined_call_operand.vmem [shape: f32[4,1,8,128], index: 0, kind: input, shape index: {}]   ;;  %s118_s1 = inlined_call_operand.vmem [shape: f32[1,128], index: 1, kind: input, shape index: {}]   ;;  %s119_s2 = inlined_call_operand.vmem [shape: f32[1,128], index: 2, kind: input, shape index: {}]   ;;  %s120_s3 = inlined_call_operand.vmem [shape: f32[1,128], index: 3, kind: output, shape index: {0}]   ;;  %s121_s4 = inlined_call_operand.vmem [shape: f32[1,128], index: 4, kind: output, shape index: {1}]  }
   0x1   :  { %v16_v0 = vld [vmem:[%s117_s0] sm:$0xff]  ;;  %v17_v1 = vld [vmem:[%s117_s0 + $0x8] sm:$0xff]  ;;  %v18_v2 = vld [vmem:[%s117_s0 + $0x10] sm:$0xff]  ;;  %v35_v14 = vunpack.c.l.s4 %v67_v13 }
   0x2   :  { %v20_v3 = vadd.f32 %v17_v1, %v16_v0  ;;  %v19_v4 = vld [vmem:[%s117_s0 + $0x18] sm:$0xff]  ;;  %v38_v17 = vshrl.u32 %v37_v15, 7  ;;  %v30_v22 = vld [vmem:[%s118_s1] sm:$0x1] }
   0x3   :  { %v36_v16 = vunpack.c.0.s8 %v35_v14  ;;  %v52_v25 = vld [vmem:[%s119_s2] sm:$0x1] }
   0x4   :  { %v21_v5 = vadd.f32 %v20_v3, %v18_v2 }
   0x5   :  { %v39_v18 = vsub.s32 %v36_v16, %v38_v17 }
   0x6   :  { %v22_v6 = vadd.f32 %v21_v5, %v19_v4 }
   0x8   :  { %v23_v7 = vmul.f32 0.0078125, %v22_v6 }
   0xa   :  { %v24_v8 = vmul.f32 %v23_v7, %v23_v7 }
   0xc   :  { %v26_v9 = vrot.slane %v24_v8, 7 }
   0xe   :  { %v28_v10 = vsub.f32 %v23_v7, %v26_v9 }
  0x10   :  { %v29_v11 = vmax.f32 %v28_v10, 0.0 }
  0x12   :  { %v31_v12 = vadd.f32 1e-05, %v29_v11 }
  0x14   :  { %65 = vrsqrt.f32 %v31_v12 }
  0x21   :  { %v66_v19 = vpop.eup %65 }
  0x22   :  { %v40_v20 = vrot.slane %v66_v19, %v39_v18 }
  0x24   :  { %v41_v21 = vcombine.high %v40_v20, %v40_v20 }
  0x26   :  { %v48_v23 = vrot.slane %v41_v21, %v39_v18 }
  0x28   :  { %v50_v24 = vmul.f32 %v48_v23, %v30_v22 }
  0x2a   :  { %51 = vst [vmem:[%s120_s3] sm:$0x1] %v50_v24  ;;  %v53_v26 = vmul.f32 %v50_v24, %v23_v7 }
  0x2c   :  { %v54_v27 = vsub.f32 %v52_v25, %v53_v26 }
  0x2e   :  { %55 = vst [vmem:[%s121_s4] sm:$0x1] %v54_v27 }

// kernel: generator_forward.18
= control target key start
LH: loop header
LB: loop body
LE: loop exit
PB: predicated region body
PF: predicated region fallthrough
CT: control target
= control target key end

     0   :  { %s566_s12 = smov 0   ;;  %s568_s13 = smov 0   ;;  %s605_s0 = inlined_call_operand.vmem [shape: bf16[4,32,128], index: 0, kind: input, shape index: {}]   ;;  %s606_s1 = inlined_call_operand.vmem [shape: f32[1,128], index: 1, kind: input, shape index: {}]   ;;  %s607_s2 = inlined_call_operand.vmem [shape: f32[1,128], index: 2, kind: input, shape index: {}]   ;;  %s608_s3 = inlined_call_operand.vmem [shape: bf16[4,32,128], index: 3, kind: output, shape index: {}]  }
   0x1   :  { %s570_s14 = smov 0  }
   0x2 LB: > { %s32_s15 = sadd.s32 1, %s540_s13  ;;  %p459_p0 = scmp.ge.s32.totalorder %s544_s14, 1  ;;  %s544_s14 = sphi %s570_s14, %s13_s14   ;;  %s540_s13 = sphi %s568_s13, %s610_s13   ;;  %s536_s12 = sphi %s566_s12, %s609_s12  }
   0x3   : > { %p34_p1 = scmp.ge.s32.totalorder %s32_s15, 4  ;;  %p188_p2 = scmp.lt.s32.totalorder %s544_s14, 5 }
   0x5   : > { %s612_s15 = smov (%p34_p1, %s32_s15), 0  ;;  %p189_p3 = pnand %p459_p0, %p188_p2 }
   0x6   : > { %p233_p4 = scmp.lt.s32.totalorder (!%p189_p3), %s536_s12, 3 }
   0x7   : > { %192 = sbr.rel (%p189_p3) target bundleno = 29 (0x1d), region = 32 }
   0xc   : > { %s614_s12 = smov (!%p233_p4, %s536_s12), 3  ;;  %v464_v2 = vld [vmem:[%s606_s1] ss:$0 sm:$0xff] }
   0xd   : > { %s472_s16 = sshll.u32 %s614_s12, 4  ;;  %v465_v7 = vld [vmem:[%s607_s2] ss:$0 sm:$0xff] }
   0xe   : > { %s243_s19 = scalar_lea.vmem %s605_s0, %s472_s16  ;;  %s262_s26 = scalar_lea.vmem %s608_s3, %s472_s16 }
   0xf   : > { %v479_v0 = vld [vmem:[%s243_s19] sm:$0xff]   ;;  %v496_v1 = vld [vmem:[%s243_s19 + $0x8] sm:$0xff]  }
  0x10   : > { %v480_v3 = vunpack.c.l.bf16 %v479_v0  ;;  %v481_v4 = vunpack.c.h.bf16 %v479_v0  ;;  %v484_v5 = vunpack.c.l.bf16 %v496_v1  ;;  %v485_v6 = vunpack.c.h.bf16 %v496_v1 }
  0x12   : > { %v279_v8 = vmul.f32 %v480_v3, %v464_v2  ;;  %v280_v9 = vmul.f32 %v481_v4, %v464_v2  ;;  %v281_v10 = vmul.f32 %v484_v5, %v464_v2  ;;  %v282_v11 = vmul.f32 %v485_v6, %v464_v2 }
  0x14   : > { %v290_v12 = vadd.f32 %v465_v7, %v279_v8  ;;  %v291_v13 = vadd.f32 %v465_v7, %v280_v9  ;;  %v292_v14 = vadd.f32 %v465_v7, %v281_v10  ;;  %v293_v15 = vadd.f32 %v465_v7, %v282_v11 }
  0x16   : > { %vm294_vm0 = vcmp.ge.f32.partialorder %v290_v12, 0.0  ;;  %vm295_vm1 = vcmp.ge.f32.partialorder %v291_v13, 0.0  ;;  %v298_v16 = vmul.f32 0.2, %v290_v12  ;;  %v299_v17 = vmul.f32 0.2, %v291_v13 }
  0x17   : > { %vm296_vm2 = vcmp.ge.f32.partialorder %v292_v14, 0.0  ;;  %vm297_vm3 = vcmp.ge.f32.partialorder %v293_v15, 0.0  ;;  %v300_v18 = vmul.f32 0.2, %v292_v14  ;;  %v301_v19 = vmul.f32 0.2, %v293_v15 }
  0x18   : > { %v302_v20 = vsel %vm294_vm0, %v290_v12, %v298_v16  ;;  %v303_v21 = vsel %vm295_vm1, %v291_v13, %v299_v17 }
  0x19   : > { %v489_v22 = vpack.c.bf16 %v303_v21, %v302_v20  ;;  %v304_v23 = vsel %vm296_vm2, %v292_v14, %v300_v18  ;;  %v305_v24 = vsel %vm297_vm3, %v293_v15, %v301_v19 }
  0x1a   : > { %v494_v25 = vpack.c.bf16 %v305_v24, %v304_v23 }
  0x1b   : > { %490 = vst [vmem:[%s262_s26] sm:$0xff] %v489_v22  }
  0x1c   : > { %497 = vst [vmem:[%s262_s26 + $0x8] sm:$0xff] %v494_v25  }
  0x1d PF: > { %s13_s14 = sadd.s32 1, %s544_s14   ;;  %s609_s12 = smov %s540_s13 }
  0x1e   : > { %p10_p5 = scmp.ge.s32.totalorder %s13_s14, 6   ;;  %s610_s13 = smov %s612_s15 }
  0x20   :  { %12 = sbr.rel (!%p10_p5) target bundleno = 2 (0x2), region = 68 }

// kernel: generator_forward.19
= control target key start
LH: loop header
LB: loop body
LE: loop exit
PB: predicated region body
PF: predicated region fallthrough
CT: control target
= control target key end

     0   :  { %s1073_s9 = smov 0   ;;  %s1075_s10 = smov 0   ;;  %s1134_s0 = inlined_call_operand.vmem [shape: bf16[4,128,128], index: 0, kind: input, shape index: {}]   ;;  %s1135_s1 = inlined_call_operand.vmem [shape: bf16[4,128,128], index: 1, kind: input, shape index: {}]   ;;  %s1136_s2 = inlined_call_operand.vmem [shape: bf16[4,128,128], index: 2, kind: output, shape index: {}]  }
   0x1   :  { %s1077_s11 = smov 0  }
   0x2 LB: > { %s38_s12 = sadd.s32 1, %s1052_s10  ;;  %p791_p0 = scmp.ge.s32.totalorder %s1056_s11, 1  ;;  %s1056_s11 = sphi %s1077_s11, %s12_s11   ;;  %s1052_s10 = sphi %s1075_s10, %s1138_s10   ;;  %s1048_s9 = sphi %s1073_s9, %s1137_s9  }
   0x3   : > { %p40_p1 = scmp.ge.s32.totalorder %s38_s12, 4  ;;  %p169_p2 = scmp.lt.s32.totalorder %s1056_s11, 5 }
   0x5   : > { %s1140_s12 = smov (%p40_p1, %s38_s12), 0  ;;  %p170_p3 = pnand %p791_p0, %p169_p2 }
   0x6   : > { %p214_p4 = scmp.lt.s32.totalorder (!%p170_p3), %s1048_s9, 3 }
   0x7   : > { %173 = sbr.rel (%p170_p3) target bundleno = 273 (0x111), region = 28 }
   0xc   : > { %s1142_s9 = smov (!%p214_p4, %s1048_s9), 3 }
   0xd   : > { %s1091_s13 = sshll.u32 %s1142_s9, 6 }
   0xe   : > { %s1097_s16 = scalar_lea.vmem %s1135_s1, %s1091_s13  ;;  %s1106_s19 = scalar_lea.vmem %s1134_s0, %s1091_s13 }
   0xf   : > { %v986_v0 = vld [vmem:[%s1097_s16 + $0x38] sm:$0xff]   ;;  %v987_v1 = vld [vmem:[%s1097_s16 + $0x30] sm:$0xff]   ;;  %v988_v2 = vld [vmem:[%s1097_s16 + $0x28] sm:$0xff]   ;;  %s245_s22 = scalar_lea.vmem %s1136_s2, %s1091_s13 }
  0x10   : > { %914 = vmatprep.subr.bf16.mxu0 %v986_v0  ;;  %946 = vmatprep.subr.bf16.mxu1 %v986_v0  ;;  %v989_v3 = vld [vmem:[%s1097_s16 + $0x20] sm:$0xff]   ;;  %v990_v6 = vld [vmem:[%s1097_s16 + $0x18] sm:$0xff]   ;;  %v991_v7 = vld [vmem:[%s1097_s16 + $0x10] sm:$0xff]  }
  0x11   : > { %915 = vmatpush3.bf16.msra.mxu0 %v986_v0  ;;  %954 = vmatpush3.bf16.msra.mxu1 %v986_v0  ;;  %v994_v4 = vld [vmem:[%s1106_s19] sm:$0xff]   ;;  %v992_v8 = vld [vmem:[%s1097_s16 + $0x8] sm:$0xff]   ;;  %v998_v12 = vld [vmem:[%s1106_s19 + $0x10] sm:$0xff]  }
  0x12   : > { %916 = vmatprep.subr.bf16.mxu0 %v987_v1  ;;  %947 = vmatprep.subr.bf16.mxu1 %v987_v1  ;;  %v995_v5 = vld [vmem:[%s1106_s19 + $0x20] sm:$0xff]   ;;  %v996_v10 = vld [vmem:[%s1106_s19 + $0x8] sm:$0xff]   ;;  %v999_v13 = vld [vmem:[%s1106_s19 + $0x30] sm:$0xff]  }
  0x13   : > { %930 = vmatprep.mubr.bf16.mxu0 %v994_v4  ;;  %938 = vmatprep.mubr.bf16.mxu1 %v995_v5  ;;  %v993_v9 = vld [vmem:[%s1097_s16] sm:$0xff]   ;;  %v997_v11 = vld [vmem:[%s1106_s19 + $0x28] sm:$0xff]   ;;  %v1000_v14 = vld [vmem:[%s1106_s19 + $0x18] sm:$0xff]  }
  0x14   : > { %v1001_v15 = vld [vmem:[%s1106_s19 + $0x38] sm:$0xff]  }
  0x15   : > { %917 = vmatpush3.bf16.msra.mxu0 %v987_v1  ;;  %955 = vmatpush3.bf16.msra.mxu1 %v987_v1 }
  0x16   : > { %918 = vmatprep.subr.bf16.mxu0 %v988_v2  ;;  %948 = vmatprep.subr.bf16.mxu1 %v988_v2 }
  0x19   : > { %919 = vmatpush3.bf16.msra.mxu0 %v988_v2  ;;  %956 = vmatpush3.bf16.msra.mxu1 %v988_v2 }
  0x1a   : > { %920 = vmatprep.subr.bf16.mxu0 %v989_v3  ;;  %949 = vmatprep.subr.bf16.mxu1 %v989_v3 }
  0x1d   : > { %921 = vmatpush3.bf16.msra.mxu0 %v989_v3  ;;  %957 = vmatpush3.bf16.msra.mxu1 %v989_v3 }
  0x1e   : > { %922 = vmatprep.subr.bf16.mxu0 %v990_v6  ;;  %950 = vmatprep.subr.bf16.mxu1 %v990_v6 }
  0x21   : > { %923 = vmatpush3.bf16.msra.mxu0 %v990_v6  ;;  %958 = vmatpush3.bf16.msra.mxu1 %v990_v6 }
  0x22   : > { %924 = vmatprep.subr.bf16.mxu0 %v991_v7  ;;  %951 = vmatprep.subr.bf16.mxu1 %v991_v7 }
  0x25   : > { %925 = vmatpush3.bf16.msra.mxu0 %v991_v7  ;;  %959 = vmatpush3.bf16.msra.mxu1 %v991_v7 }
  0x26   : > { %926 = vmatprep.subr.bf16.mxu0 %v992_v8  ;;  %952 = vmatprep.subr.bf16.mxu1 %v992_v8 }
  0x29   : > { %927 = vmatpush3.bf16.msra.mxu0 %v992_v8  ;;  %960 = vmatpush3.bf16.msra.mxu1 %v992_v8 }
  0x2a   : > { %928 = vmatprep.subr.bf16.mxu0 %v993_v9  ;;  %953 = vmatprep.subr.bf16.mxu1 %v993_v9 }
  0x2d   : > { %929 = vmatpush3.bf16.msra.mxu0 %v993_v9  ;;  %961 = vmatpush3.bf16.msra.mxu1 %v993_v9 }
  0x30   : > { %931 = vmatmul.mubr.bf16.vlgmr.msra.gmra.mxu0 %v996_v10  ;;  %939 = vmatmul.mubr.bf16.vlgmr.msra.gmra.mxu1 %v997_v11 }
  0x31   : > { %934 = vmatprep.mubr.bf16.mxu0 %v998_v12  ;;  %942 = vmatprep.mubr.bf16.mxu1 %v999_v13 }
  0x38   : > { %935 = vmatmul.mubr.bf16.gmra.mxu0 %v1000_v14  ;;  %943 = vmatmul.mubr.bf16.gmra.mxu1 %v1001_v15 }
  0xf0   : > { %v932_v16 = vpop.f32.mrf.mxu0  ;;  %v940_v17 = vpop.f32.mrf.mxu1 }
  0xf1   : > { %1002 = vtanh.f32 %v932_v16 }
  0xf2   : > { %1004 = vtanh.f32 %v940_v17  ;;  %v451_v18 = vpop.f32.mrf.mxu0  ;;  %v483_v19 = vpop.f32.mrf.mxu1 }
  0xf3   : > { %1006 = vtanh.f32 %v451_v18 }
  0xf4   : > { %1008 = vtanh.f32 %v483_v19  ;;  %v933_v20 = vpop.f32.mrf.mxu0  ;;  %v941_v21 = vpop.f32.mrf.mxu1 }
  0xf5   : > { %1010 = vtanh.f32 %v933_v20 }
  0xf6   : > { %1012 = vtanh.f32 %v941_v21  ;;  %v454_v22 = vpop.f32.mrf.mxu0  ;;  %v486_v23 = vpop.f32.mrf.mxu1 }
  0xf7   : > { %1014 = vtanh.f32 %v454_v22 }
  0xf8   : > { %1016 = vtanh.f32 %v486_v23  ;;  %v936_v24 = vpop.f32.mrf.mxu0  ;;  %v944_v25 = vpop.f32.mrf.mxu1 }
  0xf9   : > { %1018 = vtanh.f32 %v936_v24 }
  0xfa   : > { %1020 = vtanh.f32 %v944_v25  ;;  %v467_v26 = vpop.f32.mrf.mxu0  ;;  %v499_v27 = vpop.f32.mrf.mxu1 }
  0xfb   : > { %1022 = vtanh.f32 %v467_v26 }
  0xfc   : > { %1024 = vtanh.f32 %v499_v27  ;;  %v937_v28 = vpop.f32.mrf.mxu0  ;;  %v945_v29 = vpop.f32.mrf.mxu1 }
  0xfd   : > { %1026 = vtanh.f32 %v937_v28 }
  0xfe   : > { %v1003_v30 = vpop.eup %1002  ;;  %1028 = vtanh.f32 %v945_v29  ;;  %v470_v31 = vpop.f32.mrf.mxu0 }
  0xff   : > { %v502_v32 = vpop.f32.mrf.mxu1  ;;  %v1005_v33 = vpop.eup %1004  ;;  %1030 = vtanh.f32 %v470_v31 }
 0x100   : > { %v1007_v34 = vpop.eup %1006  ;;  %1032 = vtanh.f32 %v502_v32 }
 0x101   : > { %v1009_v35 = vpop.eup %1008 }
 0x102   : > { %v1011_v36 = vpop.eup %1010 }
 0x103   : > { %v1013_v37 = vpop.eup %1012  ;;  %v859_v38 = vpack.c.bf16 %v1011_v36, %v1003_v30 }
 0x104   : > { %v1015_v39 = vpop.eup %1014  ;;  %v879_v40 = vpack.c.bf16 %v1013_v37, %v1005_v33 }
 0x105   : > { %v1017_v41 = vpop.eup %1016  ;;  %891 = vst [vmem:[%s245_s22 + $0x8] sm:$0xff] %v859_v38   ;;  %v854_v42 = vpack.c.bf16 %v1015_v39, %v1007_v34 }
 0x106   : > { %v1019_v43 = vpop.eup %1018  ;;  %895 = vst [vmem:[%s245_s22 + $0x28] sm:$0xff] %v879_v40   ;;  %v874_v44 = vpack.c.bf16 %v1017_v41, %v1009_v35 }
 0x107   : > { %v1021_v45 = vpop.eup %1020  ;;  %855 = vst [vmem:[%s245_s22] sm:$0xff] %v854_v42  }
 0x108   : > { %v1023_v46 = vpop.eup %1022  ;;  %894 = vst [vmem:[%s245_s22 + $0x20] sm:$0xff] %v874_v44  }
 0x109   : > { %v1025_v47 = vpop.eup %1024 }
 0x10a   : > { %v1027_v48 = vpop.eup %1026 }
 0x10b   : > { %v1029_v49 = vpop.eup %1028  ;;  %v869_v50 = vpack.c.bf16 %v1027_v48, %v1019_v43 }
 0x10c   : > { %v1031_v51 = vpop.eup %1030  ;;  %v889_v52 = vpack.c.bf16 %v1029_v49, %v1021_v45 }
 0x10d   : > { %v1033_v53 = vpop.eup %1032  ;;  %893 = vst [vmem:[%s245_s22 + $0x18] sm:$0xff] %v869_v50   ;;  %v864_v54 = vpack.c.bf16 %v1031_v51, %v1023_v46 }
 0x10e   : > { %897 = vst [vmem:[%s245_s22 + $0x38] sm:$0xff] %v889_v52   ;;  %v884_v55 = vpack.c.bf16 %v1033_v53, %v1025_v47 }
 0x10f   : > { %892 = vst [vmem:[%s245_s22 + $0x10] sm:$0xff] %v864_v54  }
 0x110   : > { %896 = vst [vmem:[%s245_s22 + $0x30] sm:$0xff] %v884_v55  }
 0x111 PF: > { %s12_s11 = sadd.s32 1, %s1056_s11   ;;  %s1137_s9 = smov %s1052_s10 }
 0x112   : > { %p9_p5 = scmp.ge.s32.totalorder %s12_s11, 6   ;;  %s1138_s10 = smov %s1140_s12 }
 0x114   :  { %11 = sbr.rel (!%p9_p5) target bundleno = 2 (0x2), region = 70 }

</bundles_post_ra>
